<compile_context>
chip_gen: v7x
topology: tpu7x:2x2x1
jax: 0.10.0
libtpu: 0.0.40
codegen_flags: <defaults>
</compile_context>

<pallas_src>
import math
import functools

import jax
import jax.numpy as jnp
from jax.experimental import pallas as pl
from jax.experimental.pallas import tpu as pltpu  # noqa: F401  (TPU backend)

# ---------------- synthetic "BERT" config (small) ----------------
VOCAB     = 100
HIDDEN    = 32
HEADS     = 4
HEAD_DIM  = HIDDEN // HEADS
LAYERS    = 2
INTERMED  = 64
MAX_POS   = 32
N_CLASSES = 6
LN_EPS    = 1e-12
CPAD      = 128          # lane-dense padding for the classifier output


# ---------------------- fused Pallas kernel ----------------------

def _bert_fused_kernel(emb_ref, bias_ref, cls_sel_ref, labels_ref,
                       emb_ln_g_ref, emb_ln_b_ref,
                       qkv_w_ref, qkv_b_ref, o_w_ref, o_b_ref,
                       ln1_g_ref, ln1_b_ref, i_w_ref, i_b_ref,
                       f_w_ref, f_b_ref, ln2_g_ref, ln2_b_ref,
                       pool_w_ref, pool_b_ref, cls_w_ref, cls_b_ref,
                       probs_ref, loss_ref):
    f32 = jnp.float32
    bf16 = jnp.bfloat16

    def mm(a, b):
        # bf16 operands, f32 accumulation on the MXU.
        return jnp.dot(a.astype(bf16), b.astype(bf16), preferred_element_type=f32)

    def mm_nt(a, b):
        # a @ b.T  (contract last dims of both) without materializing a transpose.
        return jax.lax.dot_general(
            a.astype(bf16), b.astype(bf16),
            dimension_numbers=(((1,), (1,)), ((), ())),
            preferred_element_type=f32)

    def ln(x, g, b):
        mean = jnp.mean(x, axis=-1, keepdims=True)
        var = jnp.mean((x - mean) ** 2, axis=-1, keepdims=True)
        return (x - mean) * jax.lax.rsqrt(var + LN_EPS) * g + b

    bias = bias_ref[...]                               # (B*S, B*S) additive mask
    scale = 1.0 / math.sqrt(HEAD_DIM)

    # Embedding LayerNorm (dropout omitted: eval mode).
    h = ln(emb_ref[...], emb_ln_g_ref[...], emb_ln_b_ref[...])    # (B*S, H)

    # ---------------- encoder layers (fully unrolled, weights resident) -----
    for l in range(LAYERS):
        qkv = mm(h, qkv_w_ref[l]) + qkv_b_ref[l]       # (B*S, 3H) fused Q|K|V
        o_w_l = o_w_ref[l]                             # (H, H)

        acc = None
        for hh in range(HEADS):
            lo = hh * HEAD_DIM
            qh = qkv[:, lo:lo + HEAD_DIM]                              # (B*S, Dh)
            kh = qkv[:, HIDDEN + lo:HIDDEN + lo + HEAD_DIM]            # (B*S, Dh)
            vh = qkv[:, 2 * HIDDEN + lo:2 * HIDDEN + lo + HEAD_DIM]    # (B*S, Dh)

            s = mm_nt(qh, kh) * scale + bias           # (B*S, B*S)
            s = s - jnp.max(s, axis=-1, keepdims=True)
            p = jnp.exp(s)
            p = p * pl.reciprocal(jnp.sum(p, axis=-1, keepdims=True), approx=True)
            ctx = mm(p, vh)                            # (B*S, Dh)
            # concat(ctx_h) @ o_w  ==  sum_h ctx_h @ o_w[h*Dh:(h+1)*Dh, :]
            contrib = mm(ctx, o_w_l[lo:lo + HEAD_DIM, :])
            acc = contrib if acc is None else acc + contrib

        attn_out = acc + o_b_ref[l]
        h = ln(h + attn_out, ln1_g_ref[l], ln1_b_ref[l])

        ff = mm(h, i_w_ref[l]) + i_b_ref[l]
        # TODO(synk): HF BERT uses exact erf-GELU; tanh approximation used here.
        ff = 0.5 * ff * (1.0 + jnp.tanh(0.7978845608028654 *
                                        (ff + 0.044715 * ff * ff * ff)))
        ff = mm(ff, f_w_ref[l]) + f_b_ref[l]
        h = ln(h + ff, ln2_g_ref[l], ln2_b_ref[l])

    # ---------------- pooler (CLS token) + classifier + sigmoid -------------
    # CLS rows gathered via a tiny selection matmul (robust, stays on the MXU).
    cls_tok = jnp.dot(cls_sel_ref[...], h, preferred_element_type=f32)  # (B, H)
    pooled = jnp.tanh(mm(cls_tok, pool_w_ref[...]) + pool_b_ref[...])   # (B, H)

    logits = mm(pooled, cls_w_ref[...]) + cls_b_ref[...]                # (B, CPAD)
    probs = 1.0 / (1.0 + jnp.exp(-logits))
    probs_ref[...] = probs                                              # lane-dense store

    # ---------------- BCE loss (torch.nn.BCELoss semantics, log clamp -100) -
    labels = labels_ref[...]
    valid = jax.lax.broadcasted_iota(jnp.int32, probs.shape, 1) < N_CLASSES
    logp = jnp.maximum(jnp.log(probs), -100.0)
    log1mp = jnp.maximum(jnp.log(1.0 - probs), -100.0)
    per = -(labels * logp + (1.0 - labels) * log1mp)
    per = jnp.where(valid, per, 0.0)
    loss_ref[...] = jnp.full((1, 1),
                             jnp.sum(per) / (probs.shape[0] * N_CLASSES),
                             dtype=f32)


# ---------------------- parameters ----------------------

def init_params(key):
    def nrm(k, shape):
        return 0.02 * jax.random.normal(k, shape, jnp.float32)

    ks = iter(jax.random.split(key, 12))
    return {
        "word_emb": nrm(next(ks), (VOCAB, HIDDEN)),
        "pos_emb":  nrm(next(ks), (MAX_POS, HIDDEN)),
        "type_emb": nrm(next(ks), (2, HIDDEN)),
        "emb_ln_g": jnp.ones((1, HIDDEN), jnp.float32),
        "emb_ln_b": jnp.zeros((1, HIDDEN), jnp.float32),
        # per-layer weights stacked along a leading LAYERS axis; QKV fused.
        "qkv_w": nrm(next(ks), (LAYERS, HIDDEN, 3 * HIDDEN)),
        "qkv_b": jnp.zeros((LAYERS, 1, 3 * HIDDEN), jnp.float32),
        "o_w":   nrm(next(ks), (LAYERS, HIDDEN, HIDDEN)),
        "o_b":   jnp.zeros((LAYERS, 1, HIDDEN), jnp.float32),
        "ln1_g": jnp.ones((LAYERS, 1, HIDDEN), jnp.float32),
        "ln1_b": jnp.zeros((LAYERS, 1, HIDDEN), jnp.float32),
        "i_w":   nrm(next(ks), (LAYERS, HIDDEN, INTERMED)),
        "i_b":   jnp.zeros((LAYERS, 1, INTERMED), jnp.float32),
        "f_w":   nrm(next(ks), (LAYERS, INTERMED, HIDDEN)),
        "f_b":   jnp.zeros((LAYERS, 1, HIDDEN), jnp.float32),
        "ln2_g": jnp.ones((LAYERS, 1, HIDDEN), jnp.float32),
        "ln2_b": jnp.zeros((LAYERS, 1, HIDDEN), jnp.float32),
        "pool_w": nrm(next(ks), (HIDDEN, HIDDEN)),
        "pool_b": jnp.zeros((1, HIDDEN), jnp.float32),
        "cls_w":  nrm(next(ks), (HIDDEN, N_CLASSES)),
        "cls_b":  jnp.zeros((1, N_CLASSES), jnp.float32),
    }


# ---------------------- forward (TextTagger.forward) ----------------------

def text_tagger_forward(params, input_ids, attention_mask, labels=None):
    B, S = input_ids.shape
    BS = B * S

    # Embedding lookups (gathers stay outside the kernel).
    emb = (jnp.take(params["word_emb"], input_ids, axis=0)
           + params["pos_emb"][:S][None, :, :]
           + params["type_emb"][0][None, None, :]).reshape(BS, HIDDEN)

    # Block-diagonal additive attention bias over the flattened token axis:
    # 0 for same-batch & non-padded key, -10000 otherwise (BERT-style mask;
    # exp underflows to exactly 0 so cross-batch keys contribute nothing).
    batch_ids = jnp.repeat(jnp.arange(B), S)
    same_batch = batch_ids[:, None] == batch_ids[None, :]
    key_ok = (attention_mask.reshape(-1) > 0)[None, :]
    attn_bias = jnp.where(same_batch & key_ok, 0.0, -10000.0).astype(jnp.float32)

    # Selection matrix picking the CLS token row of every batch element.
    cls_sel = jnp.zeros((B, BS), jnp.float32).at[
        jnp.arange(B), jnp.arange(B) * S].set(1.0)

    # Lane-dense (128-wide) classifier weights / labels.
    cls_w_pad = jnp.zeros((HIDDEN, CPAD), jnp.float32).at[:, :N_CLASSES].set(params["cls_w"])
    cls_b_pad = jnp.zeros((1, CPAD), jnp.float32).at[:, :N_CLASSES].set(params["cls_b"])
    if labels is None:
        labels_pad = jnp.zeros((B, CPAD), jnp.float32)
    else:
        labels_pad = jnp.zeros((B, CPAD), jnp.float32).at[:, :N_CLASSES].set(
            labels.astype(jnp.float32))

    probs_pad, loss = pl.pallas_call(
        _bert_fused_kernel,
        out_shape=(jax.ShapeDtypeStruct((B, CPAD), jnp.float32),
                   jax.ShapeDtypeStruct((1, 1), jnp.float32)),
    )(emb, attn_bias, cls_sel, labels_pad,
      params["emb_ln_g"], params["emb_ln_b"],
      params["qkv_w"], params["qkv_b"], params["o_w"], params["o_b"],
      params["ln1_g"], params["ln1_b"], params["i_w"], params["i_b"],
      params["f_w"], params["f_b"], params["ln2_g"], params["ln2_b"],
      params["pool_w"], params["pool_b"], cls_w_pad, cls_b_pad)

    probs = probs_pad[:, :N_CLASSES]
    if labels is None:
        return jnp.zeros((), jnp.float32), probs
    return loss[0, 0], probs


# ---------------------- main ----------------------

if __name__ == "__main__":
    key = jax.random.PRNGKey(0)
    k_par, k_ids, k_lab = jax.random.split(key, 3)

    params = init_params(k_par)

    B, S = 2, 8
    input_ids = jax.random.randint(k_ids, (B, S), 0, VOCAB, dtype=jnp.int32)
    attention_mask = jnp.array(
        [[1, 1, 1, 1, 1, 1, 1, 1],
         [1, 1, 1, 1, 1, 0, 0, 0]], dtype=jnp.int32)
    labels = (jax.random.uniform(k_lab, (B, N_CLASSES)) > 0.5).astype(jnp.float32)

    fwd = jax.jit(text_tagger_forward)
    loss, probs = fwd(params, input_ids, attention_mask, labels)
    jax.block_until_ready((loss, probs))

    assert probs.shape == (B, N_CLASSES)
    assert jnp.all(jnp.isfinite(probs)) and jnp.isfinite(loss)
    assert jnp.all((probs >= 0.0) & (probs <= 1.0))
    print("KERNEL_OK")
</pallas_src>

<mosaic_0001>
module attributes {stable_mosaic.version = 11 : i64} {
  func.func @_bert_fused_kernel(%arg0: memref<16x32xf32, #tpu.memory_space<vmem>>, %arg1: memref<16x16xf32, #tpu.memory_space<vmem>>, %arg2: memref<2x16xf32, #tpu.memory_space<vmem>>, %arg3: memref<2x128xf32, #tpu.memory_space<vmem>>, %arg4: memref<1x32xf32, #tpu.memory_space<vmem>>, %arg5: memref<1x32xf32, #tpu.memory_space<vmem>>, %arg6: memref<2x32x96xf32, #tpu.memory_space<vmem>>, %arg7: memref<2x1x96xf32, #tpu.memory_space<vmem>>, %arg8: memref<2x32x32xf32, #tpu.memory_space<vmem>>, %arg9: memref<2x1x32xf32, #tpu.memory_space<vmem>>, %arg10: memref<2x1x32xf32, #tpu.memory_space<vmem>>, %arg11: memref<2x1x32xf32, #tpu.memory_space<vmem>>, %arg12: memref<2x32x64xf32, #tpu.memory_space<vmem>>, %arg13: memref<2x1x64xf32, #tpu.memory_space<vmem>>, %arg14: memref<2x64x32xf32, #tpu.memory_space<vmem>>, %arg15: memref<2x1x32xf32, #tpu.memory_space<vmem>>, %arg16: memref<2x1x32xf32, #tpu.memory_space<vmem>>, %arg17: memref<2x1x32xf32, #tpu.memory_space<vmem>>, %arg18: memref<32x32xf32, #tpu.memory_space<vmem>>, %arg19: memref<1x32xf32, #tpu.memory_space<vmem>>, %arg20: memref<32x128xf32, #tpu.memory_space<vmem>>, %arg21: memref<1x128xf32, #tpu.memory_space<vmem>>, %arg22: memref<2x128xf32, #tpu.memory_space<vmem>>, %arg23: memref<1x1xf32, #tpu.memory_space<vmem>>) attributes {dimension_semantics = [], scalar_prefetch = 0 : i64, scratch_operands = 0 : i64, tpu.core_type = #tpu.core_type<tc>} {
    %c0 = arith.constant 0 : index
    %c0_0 = arith.constant 0 : index
    %0 = vector.load %arg1[%c0, %c0_0] : memref<16x16xf32, #tpu.memory_space<vmem>>, vector<16x16xf32>
    %c0_1 = arith.constant 0 : index
    %c0_2 = arith.constant 0 : index
    %1 = vector.load %arg0[%c0_1, %c0_2] : memref<16x32xf32, #tpu.memory_space<vmem>>, vector<16x32xf32>
    %c0_3 = arith.constant 0 : index
    %c0_4 = arith.constant 0 : index
    %2 = vector.load %arg4[%c0_3, %c0_4] : memref<1x32xf32, #tpu.memory_space<vmem>>, vector<1x32xf32>
    %c0_5 = arith.constant 0 : index
    %c0_6 = arith.constant 0 : index
    %3 = vector.load %arg5[%c0_5, %c0_6] : memref<1x32xf32, #tpu.memory_space<vmem>>, vector<1x32xf32>
    %cst = arith.constant dense<0.000000e+00> : vector<16xf32>
    %4 = vector.multi_reduction <add>, %1, %cst [1] : vector<16x32xf32> to vector<16xf32>
    %5 = vector.shape_cast %4 : vector<16xf32> to vector<16x1xf32>
    %cst_7 = arith.constant 3.200000e+01 : f32
    %6 = vector.broadcast %cst_7 : f32 to vector<16x1xf32>
    %7 = arith.divf %5, %6 : vector<16x1xf32>
    %8 = vector.broadcast %7 : vector<16x1xf32> to vector<16x32xf32>
    %9 = arith.subf %1, %8 : vector<16x32xf32>
    %10 = arith.mulf %9, %9 : vector<16x32xf32>
    %cst_8 = arith.constant dense<0.000000e+00> : vector<16xf32>
    %11 = vector.multi_reduction <add>, %10, %cst_8 [1] : vector<16x32xf32> to vector<16xf32>
    %12 = vector.shape_cast %11 : vector<16xf32> to vector<16x1xf32>
    %cst_9 = arith.constant 3.200000e+01 : f32
    %13 = vector.broadcast %cst_9 : f32 to vector<16x1xf32>
    %14 = arith.divf %12, %13 : vector<16x1xf32>
    %15 = vector.broadcast %7 : vector<16x1xf32> to vector<16x32xf32>
    %16 = arith.subf %1, %15 : vector<16x32xf32>
    %cst_10 = arith.constant 9.99999996E-13 : f32
    %17 = vector.broadcast %cst_10 : f32 to vector<16x1xf32>
    %18 = arith.addf %14, %17 : vector<16x1xf32>
    %19 = math.rsqrt %18 : vector<16x1xf32>
    %20 = vector.broadcast %19 : vector<16x1xf32> to vector<16x32xf32>
    %21 = arith.mulf %16, %20 : vector<16x32xf32>
    %22 = vector.broadcast %2 : vector<1x32xf32> to vector<16x32xf32>
    %23 = arith.mulf %21, %22 : vector<16x32xf32>
    %24 = vector.broadcast %3 : vector<1x32xf32> to vector<16x32xf32>
    %25 = arith.addf %23, %24 : vector<16x32xf32>
    %c0_11 = arith.constant 0 : index
    %c0_12 = arith.constant 0 : index
    %c0_13 = arith.constant 0 : index
    %26 = vector.load %arg6[%c0_11, %c0_12, %c0_13] : memref<2x32x96xf32, #tpu.memory_space<vmem>>, vector<1x32x96xf32>
    %27 = vector.shape_cast %26 : vector<1x32x96xf32> to vector<32x96xf32>
    %28 = arith.truncf %25 : vector<16x32xf32> to vector<16x32xbf16>
    %29 = arith.truncf %27 : vector<32x96xf32> to vector<32x96xbf16>
    %cst_14 = arith.constant dense<0.000000e+00> : vector<16x96xf32>
    %30 = tpu.matmul %28, %29, %cst_14 {dimension_numbers = #tpu.dot_dimension_numbers<[1], [0], [0], [1], [0, 0, 1, 1], [], []>} : vector<16x32xbf16>, vector<32x96xbf16>, vector<16x96xf32> -> vector<16x96xf32>
    %c0_15 = arith.constant 0 : index
    %c0_16 = arith.constant 0 : index
    %c0_17 = arith.constant 0 : index
    %31 = vector.load %arg7[%c0_15, %c0_16, %c0_17] : memref<2x1x96xf32, #tpu.memory_space<vmem>>, vector<1x1x96xf32>
    %32 = vector.shape_cast %31 : vector<1x1x96xf32> to vector<1x96xf32>
    %33 = vector.broadcast %32 : vector<1x96xf32> to vector<16x96xf32>
    %34 = arith.addf %30, %33 : vector<16x96xf32>
    %c0_18 = arith.constant 0 : index
    %c0_19 = arith.constant 0 : index
    %c0_20 = arith.constant 0 : index
    %35 = vector.load %arg8[%c0_18, %c0_19, %c0_20] : memref<2x32x32xf32, #tpu.memory_space<vmem>>, vector<1x32x32xf32>
    %36 = vector.shape_cast %35 : vector<1x32x32xf32> to vector<32x32xf32>
    %37 = vector.extract_strided_slice %34 {offsets = [0, 0], sizes = [16, 8], strides = [1, 1]} : vector<16x96xf32> to vector<16x8xf32>
    %38 = vector.extract_strided_slice %34 {offsets = [0, 32], sizes = [16, 8], strides = [1, 1]} : vector<16x96xf32> to vector<16x8xf32>
    %39 = vector.extract_strided_slice %34 {offsets = [0, 64], sizes = [16, 8], strides = [1, 1]} : vector<16x96xf32> to vector<16x8xf32>
    %40 = arith.truncf %37 : vector<16x8xf32> to vector<16x8xbf16>
    %41 = arith.truncf %38 : vector<16x8xf32> to vector<16x8xbf16>
    %cst_21 = arith.constant dense<0.000000e+00> : vector<16x16xf32>
    %42 = tpu.matmul %40, %41, %cst_21 {dimension_numbers = #tpu.dot_dimension_numbers<[1], [1], [0], [0], [0, 0, 1, 0], [], []>} : vector<16x8xbf16>, vector<16x8xbf16>, vector<16x16xf32> -> vector<16x16xf32>
    %cst_22 = arith.constant 0.353553385 : f32
    %43 = vector.broadcast %cst_22 : f32 to vector<16x16xf32>
    %44 = arith.mulf %42, %43 : vector<16x16xf32>
    %45 = arith.addf %44, %0 : vector<16x16xf32>
    %cst_23 = arith.constant dense<0xFF800000> : vector<16xf32>
    %46 = vector.multi_reduction <maximumf>, %45, %cst_23 [1] : vector<16x16xf32> to vector<16xf32>
    %47 = vector.shape_cast %46 : vector<16xf32> to vector<16x1xf32>
    %48 = vector.broadcast %47 : vector<16x1xf32> to vector<16x16xf32>
    %49 = arith.subf %45, %48 : vector<16x16xf32>
    %50 = math.exp %49 : vector<16x16xf32>
    %cst_24 = arith.constant dense<0.000000e+00> : vector<16xf32>
    %51 = vector.multi_reduction <add>, %50, %cst_24 [1] : vector<16x16xf32> to vector<16xf32>
    %52 = vector.shape_cast %51 : vector<16xf32> to vector<16x1xf32>
    %53 = tpu.reciprocal %52 {approx = true} : vector<16x1xf32> -> vector<16x1xf32>
    %54 = vector.broadcast %53 : vector<16x1xf32> to vector<16x16xf32>
    %55 = arith.mulf %50, %54 : vector<16x16xf32>
    %56 = arith.truncf %55 : vector<16x16xf32> to vector<16x16xbf16>
    %57 = arith.truncf %39 : vector<16x8xf32> to vector<16x8xbf16>
    %cst_25 = arith.constant dense<0.000000e+00> : vector<16x8xf32>
    %58 = tpu.matmul %56, %57, %cst_25 {dimension_numbers = #tpu.dot_dimension_numbers<[1], [0], [0], [1], [0, 0, 1, 1], [], []>} : vector<16x16xbf16>, vector<16x8xbf16>, vector<16x8xf32> -> vector<16x8xf32>
    %59 = vector.extract_strided_slice %36 {offsets = [0, 0], sizes = [8, 32], strides = [1, 1]} : vector<32x32xf32> to vector<8x32xf32>
    %60 = arith.truncf %58 : vector<16x8xf32> to vector<16x8xbf16>
    %61 = arith.truncf %59 : vector<8x32xf32> to vector<8x32xbf16>
    %cst_26 = arith.constant dense<0.000000e+00> : vector<16x32xf32>
    %62 = tpu.matmul %60, %61, %cst_26 {dimension_numbers = #tpu.dot_dimension_numbers<[1], [0], [0], [1], [0, 0, 1, 1], [], []>} : vector<16x8xbf16>, vector<8x32xbf16>, vector<16x32xf32> -> vector<16x32xf32>
    %63 = vector.extract_strided_slice %34 {offsets = [0, 8], sizes = [16, 8], strides = [1, 1]} : vector<16x96xf32> to vector<16x8xf32>
    %64 = vector.extract_strided_slice %34 {offsets = [0, 40], sizes = [16, 8], strides = [1, 1]} : vector<16x96xf32> to vector<16x8xf32>
    %65 = vector.extract_strided_slice %34 {offsets = [0, 72], sizes = [16, 8], strides = [1, 1]} : vector<16x96xf32> to vector<16x8xf32>
    %66 = arith.truncf %63 : vector<16x8xf32> to vector<16x8xbf16>
    %67 = arith.truncf %64 : vector<16x8xf32> to vector<16x8xbf16>
    %cst_27 = arith.constant dense<0.000000e+00> : vector<16x16xf32>
    %68 = tpu.matmul %66, %67, %cst_27 {dimension_numbers = #tpu.dot_dimension_numbers<[1], [1], [0], [0], [0, 0, 1, 0], [], []>} : vector<16x8xbf16>, vector<16x8xbf16>, vector<16x16xf32> -> vector<16x16xf32>
    %cst_28 = arith.constant 0.353553385 : f32
    %69 = vector.broadcast %cst_28 : f32 to vector<16x16xf32>
    %70 = arith.mulf %68, %69 : vector<16x16xf32>
    %71 = arith.addf %70, %0 : vector<16x16xf32>
    %cst_29 = arith.constant dense<0xFF800000> : vector<16xf32>
    %72 = vector.multi_reduction <maximumf>, %71, %cst_29 [1] : vector<16x16xf32> to vector<16xf32>
    %73 = vector.shape_cast %72 : vector<16xf32> to vector<16x1xf32>
    %74 = vector.broadcast %73 : vector<16x1xf32> to vector<16x16xf32>
    %75 = arith.subf %71, %74 : vector<16x16xf32>
    %76 = math.exp %75 : vector<16x16xf32>
    %cst_30 = arith.constant dense<0.000000e+00> : vector<16xf32>
    %77 = vector.multi_reduction <add>, %76, %cst_30 [1] : vector<16x16xf32> to vector<16xf32>
    %78 = vector.shape_cast %77 : vector<16xf32> to vector<16x1xf32>
    %79 = tpu.reciprocal %78 {approx = true} : vector<16x1xf32> -> vector<16x1xf32>
    %80 = vector.broadcast %79 : vector<16x1xf32> to vector<16x16xf32>
    %81 = arith.mulf %76, %80 : vector<16x16xf32>
    %82 = arith.truncf %81 : vector<16x16xf32> to vector<16x16xbf16>
    %83 = arith.truncf %65 : vector<16x8xf32> to vector<16x8xbf16>
    %cst_31 = arith.constant dense<0.000000e+00> : vector<16x8xf32>
    %84 = tpu.matmul %82, %83, %cst_31 {dimension_numbers = #tpu.dot_dimension_numbers<[1], [0], [0], [1], [0, 0, 1, 1], [], []>} : vector<16x16xbf16>, vector<16x8xbf16>, vector<16x8xf32> -> vector<16x8xf32>
    %85 = vector.extract_strided_slice %36 {offsets = [8, 0], sizes = [8, 32], strides = [1, 1]} : vector<32x32xf32> to vector<8x32xf32>
    %86 = arith.truncf %84 : vector<16x8xf32> to vector<16x8xbf16>
    %87 = arith.truncf %85 : vector<8x32xf32> to vector<8x32xbf16>
    %cst_32 = arith.constant dense<0.000000e+00> : vector<16x32xf32>
    %88 = tpu.matmul %86, %87, %cst_32 {dimension_numbers = #tpu.dot_dimension_numbers<[1], [0], [0], [1], [0, 0, 1, 1], [], []>} : vector<16x8xbf16>, vector<8x32xbf16>, vector<16x32xf32> -> vector<16x32xf32>
    %89 = arith.addf %62, %88 : vector<16x32xf32>
    %90 = vector.extract_strided_slice %34 {offsets = [0, 16], sizes = [16, 8], strides = [1, 1]} : vector<16x96xf32> to vector<16x8xf32>
    %91 = vector.extract_strided_slice %34 {offsets = [0, 48], sizes = [16, 8], strides = [1, 1]} : vector<16x96xf32> to vector<16x8xf32>
    %92 = vector.extract_strided_slice %34 {offsets = [0, 80], sizes = [16, 8], strides = [1, 1]} : vector<16x96xf32> to vector<16x8xf32>
    %93 = arith.truncf %90 : vector<16x8xf32> to vector<16x8xbf16>
    %94 = arith.truncf %91 : vector<16x8xf32> to vector<16x8xbf16>
    %cst_33 = arith.constant dense<0.000000e+00> : vector<16x16xf32>
    %95 = tpu.matmul %93, %94, %cst_33 {dimension_numbers = #tpu.dot_dimension_numbers<[1], [1], [0], [0], [0, 0, 1, 0], [], []>} : vector<16x8xbf16>, vector<16x8xbf16>, vector<16x16xf32> -> vector<16x16xf32>
    %cst_34 = arith.constant 0.353553385 : f32
    %96 = vector.broadcast %cst_34 : f32 to vector<16x16xf32>
    %97 = arith.mulf %95, %96 : vector<16x16xf32>
    %98 = arith.addf %97, %0 : vector<16x16xf32>
    %cst_35 = arith.constant dense<0xFF800000> : vector<16xf32>
    %99 = vector.multi_reduction <maximumf>, %98, %cst_35 [1] : vector<16x16xf32> to vector<16xf32>
    %100 = vector.shape_cast %99 : vector<16xf32> to vector<16x1xf32>
    %101 = vector.broadcast %100 : vector<16x1xf32> to vector<16x16xf32>
    %102 = arith.subf %98, %101 : vector<16x16xf32>
    %103 = math.exp %102 : vector<16x16xf32>
    %cst_36 = arith.constant dense<0.000000e+00> : vector<16xf32>
    %104 = vector.multi_reduction <add>, %103, %cst_36 [1] : vector<16x16xf32> to vector<16xf32>
    %105 = vector.shape_cast %104 : vector<16xf32> to vector<16x1xf32>
    %106 = tpu.reciprocal %105 {approx = true} : vector<16x1xf32> -> vector<16x1xf32>
    %107 = vector.broadcast %106 : vector<16x1xf32> to vector<16x16xf32>
    %108 = arith.mulf %103, %107 : vector<16x16xf32>
    %109 = arith.truncf %108 : vector<16x16xf32> to vector<16x16xbf16>
    %110 = arith.truncf %92 : vector<16x8xf32> to vector<16x8xbf16>
    %cst_37 = arith.constant dense<0.000000e+00> : vector<16x8xf32>
    %111 = tpu.matmul %109, %110, %cst_37 {dimension_numbers = #tpu.dot_dimension_numbers<[1], [0], [0], [1], [0, 0, 1, 1], [], []>} : vector<16x16xbf16>, vector<16x8xbf16>, vector<16x8xf32> -> vector<16x8xf32>
    %112 = vector.extract_strided_slice %36 {offsets = [16, 0], sizes = [8, 32], strides = [1, 1]} : vector<32x32xf32> to vector<8x32xf32>
    %113 = arith.truncf %111 : vector<16x8xf32> to vector<16x8xbf16>
    %114 = arith.truncf %112 : vector<8x32xf32> to vector<8x32xbf16>
    %cst_38 = arith.constant dense<0.000000e+00> : vector<16x32xf32>
    %115 = tpu.matmul %113, %114, %cst_38 {dimension_numbers = #tpu.dot_dimension_numbers<[1], [0], [0], [1], [0, 0, 1, 1], [], []>} : vector<16x8xbf16>, vector<8x32xbf16>, vector<16x32xf32> -> vector<16x32xf32>
    %116 = arith.addf %89, %115 : vector<16x32xf32>
    %117 = vector.extract_strided_slice %34 {offsets = [0, 24], sizes = [16, 8], strides = [1, 1]} : vector<16x96xf32> to vector<16x8xf32>
    %118 = vector.extract_strided_slice %34 {offsets = [0, 56], sizes = [16, 8], strides = [1, 1]} : vector<16x96xf32> to vector<16x8xf32>
    %119 = vector.extract_strided_slice %34 {offsets = [0, 88], sizes = [16, 8], strides = [1, 1]} : vector<16x96xf32> to vector<16x8xf32>
    %120 = arith.truncf %117 : vector<16x8xf32> to vector<16x8xbf16>
    %121 = arith.truncf %118 : vector<16x8xf32> to vector<16x8xbf16>
    %cst_39 = arith.constant dense<0.000000e+00> : vector<16x16xf32>
    %122 = tpu.matmul %120, %121, %cst_39 {dimension_numbers = #tpu.dot_dimension_numbers<[1], [1], [0], [0], [0, 0, 1, 0], [], []>} : vector<16x8xbf16>, vector<16x8xbf16>, vector<16x16xf32> -> vector<16x16xf32>
    %cst_40 = arith.constant 0.353553385 : f32
    %123 = vector.broadcast %cst_40 : f32 to vector<16x16xf32>
    %124 = arith.mulf %122, %123 : vector<16x16xf32>
    %125 = arith.addf %124, %0 : vector<16x16xf32>
    %cst_41 = arith.constant dense<0xFF800000> : vector<16xf32>
    %126 = vector.multi_reduction <maximumf>, %125, %cst_41 [1] : vector<16x16xf32> to vector<16xf32>
    %127 = vector.shape_cast %126 : vector<16xf32> to vector<16x1xf32>
    %128 = vector.broadcast %127 : vector<16x1xf32> to vector<16x16xf32>
    %129 = arith.subf %125, %128 : vector<16x16xf32>
    %130 = math.exp %129 : vector<16x16xf32>
    %cst_42 = arith.constant dense<0.000000e+00> : vector<16xf32>
    %131 = vector.multi_reduction <add>, %130, %cst_42 [1] : vector<16x16xf32> to vector<16xf32>
    %132 = vector.shape_cast %131 : vector<16xf32> to vector<16x1xf32>
    %133 = tpu.reciprocal %132 {approx = true} : vector<16x1xf32> -> vector<16x1xf32>
    %134 = vector.broadcast %133 : vector<16x1xf32> to vector<16x16xf32>
    %135 = arith.mulf %130, %134 : vector<16x16xf32>
    %136 = arith.truncf %135 : vector<16x16xf32> to vector<16x16xbf16>
    %137 = arith.truncf %119 : vector<16x8xf32> to vector<16x8xbf16>
    %cst_43 = arith.constant dense<0.000000e+00> : vector<16x8xf32>
    %138 = tpu.matmul %136, %137, %cst_43 {dimension_numbers = #tpu.dot_dimension_numbers<[1], [0], [0], [1], [0, 0, 1, 1], [], []>} : vector<16x16xbf16>, vector<16x8xbf16>, vector<16x8xf32> -> vector<16x8xf32>
    %139 = vector.extract_strided_slice %36 {offsets = [24, 0], sizes = [8, 32], strides = [1, 1]} : vector<32x32xf32> to vector<8x32xf32>
    %140 = arith.truncf %138 : vector<16x8xf32> to vector<16x8xbf16>
    %141 = arith.truncf %139 : vector<8x32xf32> to vector<8x32xbf16>
    %cst_44 = arith.constant dense<0.000000e+00> : vector<16x32xf32>
    %142 = tpu.matmul %140, %141, %cst_44 {dimension_numbers = #tpu.dot_dimension_numbers<[1], [0], [0], [1], [0, 0, 1, 1], [], []>} : vector<16x8xbf16>, vector<8x32xbf16>, vector<16x32xf32> -> vector<16x32xf32>
    %143 = arith.addf %116, %142 : vector<16x32xf32>
    %c0_45 = arith.constant 0 : index
    %c0_46 = arith.constant 0 : index
    %c0_47 = arith.constant 0 : index
    %144 = vector.load %arg9[%c0_45, %c0_46, %c0_47] : memref<2x1x32xf32, #tpu.memory_space<vmem>>, vector<1x1x32xf32>
    %145 = vector.shape_cast %144 : vector<1x1x32xf32> to vector<1x32xf32>
    %146 = vector.broadcast %145 : vector<1x32xf32> to vector<16x32xf32>
    %147 = arith.addf %143, %146 : vector<16x32xf32>
    %148 = arith.addf %25, %147 : vector<16x32xf32>
    %c0_48 = arith.constant 0 : index
    %c0_49 = arith.constant 0 : index
    %c0_50 = arith.constant 0 : index
    %149 = vector.load %arg10[%c0_48, %c0_49, %c0_50] : memref<2x1x32xf32, #tpu.memory_space<vmem>>, vector<1x1x32xf32>
    %150 = vector.shape_cast %149 : vector<1x1x32xf32> to vector<1x32xf32>
    %c0_51 = arith.constant 0 : index
    %c0_52 = arith.constant 0 : index
    %c0_53 = arith.constant 0 : index
    %151 = vector.load %arg11[%c0_51, %c0_52, %c0_53] : memref<2x1x32xf32, #tpu.memory_space<vmem>>, vector<1x1x32xf32>
    %152 = vector.shape_cast %151 : vector<1x1x32xf32> to vector<1x32xf32>
    %cst_54 = arith.constant dense<0.000000e+00> : vector<16xf32>
    %153 = vector.multi_reduction <add>, %148, %cst_54 [1] : vector<16x32xf32> to vector<16xf32>
    %154 = vector.shape_cast %153 : vector<16xf32> to vector<16x1xf32>
    %cst_55 = arith.constant 3.200000e+01 : f32
    %155 = vector.broadcast %cst_55 : f32 to vector<16x1xf32>
    %156 = arith.divf %154, %155 : vector<16x1xf32>
    %157 = vector.broadcast %156 : vector<16x1xf32> to vector<16x32xf32>
    %158 = arith.subf %148, %157 : vector<16x32xf32>
    %159 = arith.mulf %158, %158 : vector<16x32xf32>
    %cst_56 = arith.constant dense<0.000000e+00> : vector<16xf32>
    %160 = vector.multi_reduction <add>, %159, %cst_56 [1] : vector<16x32xf32> to vector<16xf32>
    %161 = vector.shape_cast %160 : vector<16xf32> to vector<16x1xf32>
    %cst_57 = arith.constant 3.200000e+01 : f32
    %162 = vector.broadcast %cst_57 : f32 to vector<16x1xf32>
    %163 = arith.divf %161, %162 : vector<16x1xf32>
    %164 = vector.broadcast %156 : vector<16x1xf32> to vector<16x32xf32>
    %165 = arith.subf %148, %164 : vector<16x32xf32>
    %cst_58 = arith.constant 9.99999996E-13 : f32
    %166 = vector.broadcast %cst_58 : f32 to vector<16x1xf32>
    %167 = arith.addf %163, %166 : vector<16x1xf32>
    %168 = math.rsqrt %167 : vector<16x1xf32>
    %169 = vector.broadcast %168 : vector<16x1xf32> to vector<16x32xf32>
    %170 = arith.mulf %165, %169 : vector<16x32xf32>
    %171 = vector.broadcast %150 : vector<1x32xf32> to vector<16x32xf32>
    %172 = arith.mulf %170, %171 : vector<16x32xf32>
    %173 = vector.broadcast %152 : vector<1x32xf32> to vector<16x32xf32>
    %174 = arith.addf %172, %173 : vector<16x32xf32>
    %c0_59 = arith.constant 0 : index
    %c0_60 = arith.constant 0 : index
    %c0_61 = arith.constant 0 : index
    %175 = vector.load %arg12[%c0_59, %c0_60, %c0_61] : memref<2x32x64xf32, #tpu.memory_space<vmem>>, vector<1x32x64xf32>
    %176 = vector.shape_cast %175 : vector<1x32x64xf32> to vector<32x64xf32>
    %177 = arith.truncf %174 : vector<16x32xf32> to vector<16x32xbf16>
    %178 = arith.truncf %176 : vector<32x64xf32> to vector<32x64xbf16>
    %cst_62 = arith.constant dense<0.000000e+00> : vector<16x64xf32>
    %179 = tpu.matmul %177, %178, %cst_62 {dimension_numbers = #tpu.dot_dimension_numbers<[1], [0], [0], [1], [0, 0, 1, 1], [], []>} : vector<16x32xbf16>, vector<32x64xbf16>, vector<16x64xf32> -> vector<16x64xf32>
    %c0_63 = arith.constant 0 : index
    %c0_64 = arith.constant 0 : index
    %c0_65 = arith.constant 0 : index
    %180 = vector.load %arg13[%c0_63, %c0_64, %c0_65] : memref<2x1x64xf32, #tpu.memory_space<vmem>>, vector<1x1x64xf32>
    %181 = vector.shape_cast %180 : vector<1x1x64xf32> to vector<1x64xf32>
    %182 = vector.broadcast %181 : vector<1x64xf32> to vector<16x64xf32>
    %183 = arith.addf %179, %182 : vector<16x64xf32>
    %cst_66 = arith.constant 5.000000e-01 : f32
    %184 = vector.broadcast %cst_66 : f32 to vector<16x64xf32>
    %185 = arith.mulf %184, %183 : vector<16x64xf32>
    %cst_67 = arith.constant 4.471500e-02 : f32
    %186 = vector.broadcast %cst_67 : f32 to vector<16x64xf32>
    %187 = arith.mulf %186, %183 : vector<16x64xf32>
    %188 = arith.mulf %187, %183 : vector<16x64xf32>
    %189 = arith.mulf %188, %183 : vector<16x64xf32>
    %190 = arith.addf %183, %189 : vector<16x64xf32>
    %cst_68 = arith.constant 0.797884583 : f32
    %191 = vector.broadcast %cst_68 : f32 to vector<16x64xf32>
    %192 = arith.mulf %191, %190 : vector<16x64xf32>
    %193 = math.tanh %192 : vector<16x64xf32>
    %cst_69 = arith.constant 1.000000e+00 : f32
    %194 = vector.broadcast %cst_69 : f32 to vector<16x64xf32>
    %195 = arith.addf %194, %193 : vector<16x64xf32>
    %196 = arith.mulf %185, %195 : vector<16x64xf32>
    %c0_70 = arith.constant 0 : index
    %c0_71 = arith.constant 0 : index
    %c0_72 = arith.constant 0 : index
    %197 = vector.load %arg14[%c0_70, %c0_71, %c0_72] : memref<2x64x32xf32, #tpu.memory_space<vmem>>, vector<1x64x32xf32>
    %198 = vector.shape_cast %197 : vector<1x64x32xf32> to vector<64x32xf32>
    %199 = arith.truncf %196 : vector<16x64xf32> to vector<16x64xbf16>
    %200 = arith.truncf %198 : vector<64x32xf32> to vector<64x32xbf16>
    %cst_73 = arith.constant dense<0.000000e+00> : vector<16x32xf32>
    %201 = tpu.matmul %199, %200, %cst_73 {dimension_numbers = #tpu.dot_dimension_numbers<[1], [0], [0], [1], [0, 0, 1, 1], [], []>} : vector<16x64xbf16>, vector<64x32xbf16>, vector<16x32xf32> -> vector<16x32xf32>
    %c0_74 = arith.constant 0 : index
    %c0_75 = arith.constant 0 : index
    %c0_76 = arith.constant 0 : index
    %202 = vector.load %arg15[%c0_74, %c0_75, %c0_76] : memref<2x1x32xf32, #tpu.memory_space<vmem>>, vector<1x1x32xf32>
    %203 = vector.shape_cast %202 : vector<1x1x32xf32> to vector<1x32xf32>
    %204 = vector.broadcast %203 : vector<1x32xf32> to vector<16x32xf32>
    %205 = arith.addf %201, %204 : vector<16x32xf32>
    %206 = arith.addf %174, %205 : vector<16x32xf32>
    %c0_77 = arith.constant 0 : index
    %c0_78 = arith.constant 0 : index
    %c0_79 = arith.constant 0 : index
    %207 = vector.load %arg16[%c0_77, %c0_78, %c0_79] : memref<2x1x32xf32, #tpu.memory_space<vmem>>, vector<1x1x32xf32>
    %208 = vector.shape_cast %207 : vector<1x1x32xf32> to vector<1x32xf32>
    %c0_80 = arith.constant 0 : index
    %c0_81 = arith.constant 0 : index
    %c0_82 = arith.constant 0 : index
    %209 = vector.load %arg17[%c0_80, %c0_81, %c0_82] : memref<2x1x32xf32, #tpu.memory_space<vmem>>, vector<1x1x32xf32>
    %210 = vector.shape_cast %209 : vector<1x1x32xf32> to vector<1x32xf32>
    %cst_83 = arith.constant dense<0.000000e+00> : vector<16xf32>
    %211 = vector.multi_reduction <add>, %206, %cst_83 [1] : vector<16x32xf32> to vector<16xf32>
    %212 = vector.shape_cast %211 : vector<16xf32> to vector<16x1xf32>
    %cst_84 = arith.constant 3.200000e+01 : f32
    %213 = vector.broadcast %cst_84 : f32 to vector<16x1xf32>
    %214 = arith.divf %212, %213 : vector<16x1xf32>
    %215 = vector.broadcast %214 : vector<16x1xf32> to vector<16x32xf32>
    %216 = arith.subf %206, %215 : vector<16x32xf32>
    %217 = arith.mulf %216, %216 : vector<16x32xf32>
    %cst_85 = arith.constant dense<0.000000e+00> : vector<16xf32>
    %218 = vector.multi_reduction <add>, %217, %cst_85 [1] : vector<16x32xf32> to vector<16xf32>
    %219 = vector.shape_cast %218 : vector<16xf32> to vector<16x1xf32>
    %cst_86 = arith.constant 3.200000e+01 : f32
    %220 = vector.broadcast %cst_86 : f32 to vector<16x1xf32>
    %221 = arith.divf %219, %220 : vector<16x1xf32>
    %222 = vector.broadcast %214 : vector<16x1xf32> to vector<16x32xf32>
    %223 = arith.subf %206, %222 : vector<16x32xf32>
    %cst_87 = arith.constant 9.99999996E-13 : f32
    %224 = vector.broadcast %cst_87 : f32 to vector<16x1xf32>
    %225 = arith.addf %221, %224 : vector<16x1xf32>
    %226 = math.rsqrt %225 : vector<16x1xf32>
    %227 = vector.broadcast %226 : vector<16x1xf32> to vector<16x32xf32>
    %228 = arith.mulf %223, %227 : vector<16x32xf32>
    %229 = vector.broadcast %208 : vector<1x32xf32> to vector<16x32xf32>
    %230 = arith.mulf %228, %229 : vector<16x32xf32>
    %231 = vector.broadcast %210 : vector<1x32xf32> to vector<16x32xf32>
    %232 = arith.addf %230, %231 : vector<16x32xf32>
    %c1 = arith.constant 1 : index
    %c0_88 = arith.constant 0 : index
    %c0_89 = arith.constant 0 : index
    %233 = vector.load %arg6[%c1, %c0_88, %c0_89] : memref<2x32x96xf32, #tpu.memory_space<vmem>>, vector<1x32x96xf32>
    %234 = vector.shape_cast %233 : vector<1x32x96xf32> to vector<32x96xf32>
    %235 = arith.truncf %232 : vector<16x32xf32> to vector<16x32xbf16>
    %236 = arith.truncf %234 : vector<32x96xf32> to vector<32x96xbf16>
    %cst_90 = arith.constant dense<0.000000e+00> : vector<16x96xf32>
    %237 = tpu.matmul %235, %236, %cst_90 {dimension_numbers = #tpu.dot_dimension_numbers<[1], [0], [0], [1], [0, 0, 1, 1], [], []>} : vector<16x32xbf16>, vector<32x96xbf16>, vector<16x96xf32> -> vector<16x96xf32>
    %c1_91 = arith.constant 1 : index
    %c0_92 = arith.constant 0 : index
    %c0_93 = arith.constant 0 : index
    %238 = vector.load %arg7[%c1_91, %c0_92, %c0_93] : memref<2x1x96xf32, #tpu.memory_space<vmem>>, vector<1x1x96xf32>
    %239 = vector.shape_cast %238 : vector<1x1x96xf32> to vector<1x96xf32>
    %240 = vector.broadcast %239 : vector<1x96xf32> to vector<16x96xf32>
    %241 = arith.addf %237, %240 : vector<16x96xf32>
    %c1_94 = arith.constant 1 : index
    %c0_95 = arith.constant 0 : index
    %c0_96 = arith.constant 0 : index
    %242 = vector.load %arg8[%c1_94, %c0_95, %c0_96] : memref<2x32x32xf32, #tpu.memory_space<vmem>>, vector<1x32x32xf32>
    %243 = vector.shape_cast %242 : vector<1x32x32xf32> to vector<32x32xf32>
    %244 = vector.extract_strided_slice %241 {offsets = [0, 0], sizes = [16, 8], strides = [1, 1]} : vector<16x96xf32> to vector<16x8xf32>
    %245 = vector.extract_strided_slice %241 {offsets = [0, 32], sizes = [16, 8], strides = [1, 1]} : vector<16x96xf32> to vector<16x8xf32>
    %246 = vector.extract_strided_slice %241 {offsets = [0, 64], sizes = [16, 8], strides = [1, 1]} : vector<16x96xf32> to vector<16x8xf32>
    %247 = arith.truncf %244 : vector<16x8xf32> to vector<16x8xbf16>
    %248 = arith.truncf %245 : vector<16x8xf32> to vector<16x8xbf16>
    %cst_97 = arith.constant dense<0.000000e+00> : vector<16x16xf32>
    %249 = tpu.matmul %247, %248, %cst_97 {dimension_numbers = #tpu.dot_dimension_numbers<[1], [1], [0], [0], [0, 0, 1, 0], [], []>} : vector<16x8xbf16>, vector<16x8xbf16>, vector<16x16xf32> -> vector<16x16xf32>
    %cst_98 = arith.constant 0.353553385 : f32
    %250 = vector.broadcast %cst_98 : f32 to vector<16x16xf32>
    %251 = arith.mulf %249, %250 : vector<16x16xf32>
    %252 = arith.addf %251, %0 : vector<16x16xf32>
    %cst_99 = arith.constant dense<0xFF800000> : vector<16xf32>
    %253 = vector.multi_reduction <maximumf>, %252, %cst_99 [1] : vector<16x16xf32> to vector<16xf32>
    %254 = vector.shape_cast %253 : vector<16xf32> to vector<16x1xf32>
    %255 = vector.broadcast %254 : vector<16x1xf32> to vector<16x16xf32>
    %256 = arith.subf %252, %255 : vector<16x16xf32>
    %257 = math.exp %256 : vector<16x16xf32>
    %cst_100 = arith.constant dense<0.000000e+00> : vector<16xf32>
    %258 = vector.multi_reduction <add>, %257, %cst_100 [1] : vector<16x16xf32> to vector<16xf32>
    %259 = vector.shape_cast %258 : vector<16xf32> to vector<16x1xf32>
    %260 = tpu.reciprocal %259 {approx = true} : vector<16x1xf32> -> vector<16x1xf32>
    %261 = vector.broadcast %260 : vector<16x1xf32> to vector<16x16xf32>
    %262 = arith.mulf %257, %261 : vector<16x16xf32>
    %263 = arith.truncf %262 : vector<16x16xf32> to vector<16x16xbf16>
    %264 = arith.truncf %246 : vector<16x8xf32> to vector<16x8xbf16>
    %cst_101 = arith.constant dense<0.000000e+00> : vector<16x8xf32>
    %265 = tpu.matmul %263, %264, %cst_101 {dimension_numbers = #tpu.dot_dimension_numbers<[1], [0], [0], [1], [0, 0, 1, 1], [], []>} : vector<16x16xbf16>, vector<16x8xbf16>, vector<16x8xf32> -> vector<16x8xf32>
    %266 = vector.extract_strided_slice %243 {offsets = [0, 0], sizes = [8, 32], strides = [1, 1]} : vector<32x32xf32> to vector<8x32xf32>
    %267 = arith.truncf %265 : vector<16x8xf32> to vector<16x8xbf16>
    %268 = arith.truncf %266 : vector<8x32xf32> to vector<8x32xbf16>
    %cst_102 = arith.constant dense<0.000000e+00> : vector<16x32xf32>
    %269 = tpu.matmul %267, %268, %cst_102 {dimension_numbers = #tpu.dot_dimension_numbers<[1], [0], [0], [1], [0, 0, 1, 1], [], []>} : vector<16x8xbf16>, vector<8x32xbf16>, vector<16x32xf32> -> vector<16x32xf32>
    %270 = vector.extract_strided_slice %241 {offsets = [0, 8], sizes = [16, 8], strides = [1, 1]} : vector<16x96xf32> to vector<16x8xf32>
    %271 = vector.extract_strided_slice %241 {offsets = [0, 40], sizes = [16, 8], strides = [1, 1]} : vector<16x96xf32> to vector<16x8xf32>
    %272 = vector.extract_strided_slice %241 {offsets = [0, 72], sizes = [16, 8], strides = [1, 1]} : vector<16x96xf32> to vector<16x8xf32>
    %273 = arith.truncf %270 : vector<16x8xf32> to vector<16x8xbf16>
    %274 = arith.truncf %271 : vector<16x8xf32> to vector<16x8xbf16>
    %cst_103 = arith.constant dense<0.000000e+00> : vector<16x16xf32>
    %275 = tpu.matmul %273, %274, %cst_103 {dimension_numbers = #tpu.dot_dimension_numbers<[1], [1], [0], [0], [0, 0, 1, 0], [], []>} : vector<16x8xbf16>, vector<16x8xbf16>, vector<16x16xf32> -> vector<16x16xf32>
    %cst_104 = arith.constant 0.353553385 : f32
    %276 = vector.broadcast %cst_104 : f32 to vector<16x16xf32>
    %277 = arith.mulf %275, %276 : vector<16x16xf32>
    %278 = arith.addf %277, %0 : vector<16x16xf32>
    %cst_105 = arith.constant dense<0xFF800000> : vector<16xf32>
    %279 = vector.multi_reduction <maximumf>, %278, %cst_105 [1] : vector<16x16xf32> to vector<16xf32>
    %280 = vector.shape_cast %279 : vector<16xf32> to vector<16x1xf32>
    %281 = vector.broadcast %280 : vector<16x1xf32> to vector<16x16xf32>
    %282 = arith.subf %278, %281 : vector<16x16xf32>
    %283 = math.exp %282 : vector<16x16xf32>
    %cst_106 = arith.constant dense<0.000000e+00> : vector<16xf32>
    %284 = vector.multi_reduction <add>, %283, %cst_106 [1] : vector<16x16xf32> to vector<16xf32>
    %285 = vector.shape_cast %284 : vector<16xf32> to vector<16x1xf32>
    %286 = tpu.reciprocal %285 {approx = true} : vector<16x1xf32> -> vector<16x1xf32>
    %287 = vector.broadcast %286 : vector<16x1xf32> to vector<16x16xf32>
    %288 = arith.mulf %283, %287 : vector<16x16xf32>
    %289 = arith.truncf %288 : vector<16x16xf32> to vector<16x16xbf16>
    %290 = arith.truncf %272 : vector<16x8xf32> to vector<16x8xbf16>
    %cst_107 = arith.constant dense<0.000000e+00> : vector<16x8xf32>
    %291 = tpu.matmul %289, %290, %cst_107 {dimension_numbers = #tpu.dot_dimension_numbers<[1], [0], [0], [1], [0, 0, 1, 1], [], []>} : vector<16x16xbf16>, vector<16x8xbf16>, vector<16x8xf32> -> vector<16x8xf32>
    %292 = vector.extract_strided_slice %243 {offsets = [8, 0], sizes = [8, 32], strides = [1, 1]} : vector<32x32xf32> to vector<8x32xf32>
    %293 = arith.truncf %291 : vector<16x8xf32> to vector<16x8xbf16>
    %294 = arith.truncf %292 : vector<8x32xf32> to vector<8x32xbf16>
    %cst_108 = arith.constant dense<0.000000e+00> : vector<16x32xf32>
    %295 = tpu.matmul %293, %294, %cst_108 {dimension_numbers = #tpu.dot_dimension_numbers<[1], [0], [0], [1], [0, 0, 1, 1], [], []>} : vector<16x8xbf16>, vector<8x32xbf16>, vector<16x32xf32> -> vector<16x32xf32>
    %296 = arith.addf %269, %295 : vector<16x32xf32>
    %297 = vector.extract_strided_slice %241 {offsets = [0, 16], sizes = [16, 8], strides = [1, 1]} : vector<16x96xf32> to vector<16x8xf32>
    %298 = vector.extract_strided_slice %241 {offsets = [0, 48], sizes = [16, 8], strides = [1, 1]} : vector<16x96xf32> to vector<16x8xf32>
    %299 = vector.extract_strided_slice %241 {offsets = [0, 80], sizes = [16, 8], strides = [1, 1]} : vector<16x96xf32> to vector<16x8xf32>
    %300 = arith.truncf %297 : vector<16x8xf32> to vector<16x8xbf16>
    %301 = arith.truncf %298 : vector<16x8xf32> to vector<16x8xbf16>
    %cst_109 = arith.constant dense<0.000000e+00> : vector<16x16xf32>
    %302 = tpu.matmul %300, %301, %cst_109 {dimension_numbers = #tpu.dot_dimension_numbers<[1], [1], [0], [0], [0, 0, 1, 0], [], []>} : vector<16x8xbf16>, vector<16x8xbf16>, vector<16x16xf32> -> vector<16x16xf32>
    %cst_110 = arith.constant 0.353553385 : f32
    %303 = vector.broadcast %cst_110 : f32 to vector<16x16xf32>
    %304 = arith.mulf %302, %303 : vector<16x16xf32>
    %305 = arith.addf %304, %0 : vector<16x16xf32>
    %cst_111 = arith.constant dense<0xFF800000> : vector<16xf32>
    %306 = vector.multi_reduction <maximumf>, %305, %cst_111 [1] : vector<16x16xf32> to vector<16xf32>
    %307 = vector.shape_cast %306 : vector<16xf32> to vector<16x1xf32>
    %308 = vector.broadcast %307 : vector<16x1xf32> to vector<16x16xf32>
    %309 = arith.subf %305, %308 : vector<16x16xf32>
    %310 = math.exp %309 : vector<16x16xf32>
    %cst_112 = arith.constant dense<0.000000e+00> : vector<16xf32>
    %311 = vector.multi_reduction <add>, %310, %cst_112 [1] : vector<16x16xf32> to vector<16xf32>
    %312 = vector.shape_cast %311 : vector<16xf32> to vector<16x1xf32>
    %313 = tpu.reciprocal %312 {approx = true} : vector<16x1xf32> -> vector<16x1xf32>
    %314 = vector.broadcast %313 : vector<16x1xf32> to vector<16x16xf32>
    %315 = arith.mulf %310, %314 : vector<16x16xf32>
    %316 = arith.truncf %315 : vector<16x16xf32> to vector<16x16xbf16>
    %317 = arith.truncf %299 : vector<16x8xf32> to vector<16x8xbf16>
    %cst_113 = arith.constant dense<0.000000e+00> : vector<16x8xf32>
    %318 = tpu.matmul %316, %317, %cst_113 {dimension_numbers = #tpu.dot_dimension_numbers<[1], [0], [0], [1], [0, 0, 1, 1], [], []>} : vector<16x16xbf16>, vector<16x8xbf16>, vector<16x8xf32> -> vector<16x8xf32>
    %319 = vector.extract_strided_slice %243 {offsets = [16, 0], sizes = [8, 32], strides = [1, 1]} : vector<32x32xf32> to vector<8x32xf32>
    %320 = arith.truncf %318 : vector<16x8xf32> to vector<16x8xbf16>
    %321 = arith.truncf %319 : vector<8x32xf32> to vector<8x32xbf16>
    %cst_114 = arith.constant dense<0.000000e+00> : vector<16x32xf32>
    %322 = tpu.matmul %320, %321, %cst_114 {dimension_numbers = #tpu.dot_dimension_numbers<[1], [0], [0], [1], [0, 0, 1, 1], [], []>} : vector<16x8xbf16>, vector<8x32xbf16>, vector<16x32xf32> -> vector<16x32xf32>
    %323 = arith.addf %296, %322 : vector<16x32xf32>
    %324 = vector.extract_strided_slice %241 {offsets = [0, 24], sizes = [16, 8], strides = [1, 1]} : vector<16x96xf32> to vector<16x8xf32>
    %325 = vector.extract_strided_slice %241 {offsets = [0, 56], sizes = [16, 8], strides = [1, 1]} : vector<16x96xf32> to vector<16x8xf32>
    %326 = vector.extract_strided_slice %241 {offsets = [0, 88], sizes = [16, 8], strides = [1, 1]} : vector<16x96xf32> to vector<16x8xf32>
    %327 = arith.truncf %324 : vector<16x8xf32> to vector<16x8xbf16>
    %328 = arith.truncf %325 : vector<16x8xf32> to vector<16x8xbf16>
    %cst_115 = arith.constant dense<0.000000e+00> : vector<16x16xf32>
    %329 = tpu.matmul %327, %328, %cst_115 {dimension_numbers = #tpu.dot_dimension_numbers<[1], [1], [0], [0], [0, 0, 1, 0], [], []>} : vector<16x8xbf16>, vector<16x8xbf16>, vector<16x16xf32> -> vector<16x16xf32>
    %cst_116 = arith.constant 0.353553385 : f32
    %330 = vector.broadcast %cst_116 : f32 to vector<16x16xf32>
    %331 = arith.mulf %329, %330 : vector<16x16xf32>
    %332 = arith.addf %331, %0 : vector<16x16xf32>
    %cst_117 = arith.constant dense<0xFF800000> : vector<16xf32>
    %333 = vector.multi_reduction <maximumf>, %332, %cst_117 [1] : vector<16x16xf32> to vector<16xf32>
    %334 = vector.shape_cast %333 : vector<16xf32> to vector<16x1xf32>
    %335 = vector.broadcast %334 : vector<16x1xf32> to vector<16x16xf32>
    %336 = arith.subf %332, %335 : vector<16x16xf32>
    %337 = math.exp %336 : vector<16x16xf32>
    %cst_118 = arith.constant dense<0.000000e+00> : vector<16xf32>
    %338 = vector.multi_reduction <add>, %337, %cst_118 [1] : vector<16x16xf32> to vector<16xf32>
    %339 = vector.shape_cast %338 : vector<16xf32> to vector<16x1xf32>
    %340 = tpu.reciprocal %339 {approx = true} : vector<16x1xf32> -> vector<16x1xf32>
    %341 = vector.broadcast %340 : vector<16x1xf32> to vector<16x16xf32>
    %342 = arith.mulf %337, %341 : vector<16x16xf32>
    %343 = arith.truncf %342 : vector<16x16xf32> to vector<16x16xbf16>
    %344 = arith.truncf %326 : vector<16x8xf32> to vector<16x8xbf16>
    %cst_119 = arith.constant dense<0.000000e+00> : vector<16x8xf32>
    %345 = tpu.matmul %343, %344, %cst_119 {dimension_numbers = #tpu.dot_dimension_numbers<[1], [0], [0], [1], [0, 0, 1, 1], [], []>} : vector<16x16xbf16>, vector<16x8xbf16>, vector<16x8xf32> -> vector<16x8xf32>
    %346 = vector.extract_strided_slice %243 {offsets = [24, 0], sizes = [8, 32], strides = [1, 1]} : vector<32x32xf32> to vector<8x32xf32>
    %347 = arith.truncf %345 : vector<16x8xf32> to vector<16x8xbf16>
    %348 = arith.truncf %346 : vector<8x32xf32> to vector<8x32xbf16>
    %cst_120 = arith.constant dense<0.000000e+00> : vector<16x32xf32>
    %349 = tpu.matmul %347, %348, %cst_120 {dimension_numbers = #tpu.dot_dimension_numbers<[1], [0], [0], [1], [0, 0, 1, 1], [], []>} : vector<16x8xbf16>, vector<8x32xbf16>, vector<16x32xf32> -> vector<16x32xf32>
    %350 = arith.addf %323, %349 : vector<16x32xf32>
    %c1_121 = arith.constant 1 : index
    %c0_122 = arith.constant 0 : index
    %c0_123 = arith.constant 0 : index
    %351 = vector.load %arg9[%c1_121, %c0_122, %c0_123] : memref<2x1x32xf32, #tpu.memory_space<vmem>>, vector<1x1x32xf32>
    %352 = vector.shape_cast %351 : vector<1x1x32xf32> to vector<1x32xf32>
    %353 = vector.broadcast %352 : vector<1x32xf32> to vector<16x32xf32>
    %354 = arith.addf %350, %353 : vector<16x32xf32>
    %355 = arith.addf %232, %354 : vector<16x32xf32>
    %c1_124 = arith.constant 1 : index
    %c0_125 = arith.constant 0 : index
    %c0_126 = arith.constant 0 : index
    %356 = vector.load %arg10[%c1_124, %c0_125, %c0_126] : memref<2x1x32xf32, #tpu.memory_space<vmem>>, vector<1x1x32xf32>
    %357 = vector.shape_cast %356 : vector<1x1x32xf32> to vector<1x32xf32>
    %c1_127 = arith.constant 1 : index
    %c0_128 = arith.constant 0 : index
    %c0_129 = arith.constant 0 : index
    %358 = vector.load %arg11[%c1_127, %c0_128, %c0_129] : memref<2x1x32xf32, #tpu.memory_space<vmem>>, vector<1x1x32xf32>
    %359 = vector.shape_cast %358 : vector<1x1x32xf32> to vector<1x32xf32>
    %cst_130 = arith.constant dense<0.000000e+00> : vector<16xf32>
    %360 = vector.multi_reduction <add>, %355, %cst_130 [1] : vector<16x32xf32> to vector<16xf32>
    %361 = vector.shape_cast %360 : vector<16xf32> to vector<16x1xf32>
    %cst_131 = arith.constant 3.200000e+01 : f32
    %362 = vector.broadcast %cst_131 : f32 to vector<16x1xf32>
    %363 = arith.divf %361, %362 : vector<16x1xf32>
    %364 = vector.broadcast %363 : vector<16x1xf32> to vector<16x32xf32>
    %365 = arith.subf %355, %364 : vector<16x32xf32>
    %366 = arith.mulf %365, %365 : vector<16x32xf32>
    %cst_132 = arith.constant dense<0.000000e+00> : vector<16xf32>
    %367 = vector.multi_reduction <add>, %366, %cst_132 [1] : vector<16x32xf32> to vector<16xf32>
    %368 = vector.shape_cast %367 : vector<16xf32> to vector<16x1xf32>
    %cst_133 = arith.constant 3.200000e+01 : f32
    %369 = vector.broadcast %cst_133 : f32 to vector<16x1xf32>
    %370 = arith.divf %368, %369 : vector<16x1xf32>
    %371 = vector.broadcast %363 : vector<16x1xf32> to vector<16x32xf32>
    %372 = arith.subf %355, %371 : vector<16x32xf32>
    %cst_134 = arith.constant 9.99999996E-13 : f32
    %373 = vector.broadcast %cst_134 : f32 to vector<16x1xf32>
    %374 = arith.addf %370, %373 : vector<16x1xf32>
    %375 = math.rsqrt %374 : vector<16x1xf32>
    %376 = vector.broadcast %375 : vector<16x1xf32> to vector<16x32xf32>
    %377 = arith.mulf %372, %376 : vector<16x32xf32>
    %378 = vector.broadcast %357 : vector<1x32xf32> to vector<16x32xf32>
    %379 = arith.mulf %377, %378 : vector<16x32xf32>
    %380 = vector.broadcast %359 : vector<1x32xf32> to vector<16x32xf32>
    %381 = arith.addf %379, %380 : vector<16x32xf32>
    %c1_135 = arith.constant 1 : index
    %c0_136 = arith.constant 0 : index
    %c0_137 = arith.constant 0 : index
    %382 = vector.load %arg12[%c1_135, %c0_136, %c0_137] : memref<2x32x64xf32, #tpu.memory_space<vmem>>, vector<1x32x64xf32>
    %383 = vector.shape_cast %382 : vector<1x32x64xf32> to vector<32x64xf32>
    %384 = arith.truncf %381 : vector<16x32xf32> to vector<16x32xbf16>
    %385 = arith.truncf %383 : vector<32x64xf32> to vector<32x64xbf16>
    %cst_138 = arith.constant dense<0.000000e+00> : vector<16x64xf32>
    %386 = tpu.matmul %384, %385, %cst_138 {dimension_numbers = #tpu.dot_dimension_numbers<[1], [0], [0], [1], [0, 0, 1, 1], [], []>} : vector<16x32xbf16>, vector<32x64xbf16>, vector<16x64xf32> -> vector<16x64xf32>
    %c1_139 = arith.constant 1 : index
    %c0_140 = arith.constant 0 : index
    %c0_141 = arith.constant 0 : index
    %387 = vector.load %arg13[%c1_139, %c0_140, %c0_141] : memref<2x1x64xf32, #tpu.memory_space<vmem>>, vector<1x1x64xf32>
    %388 = vector.shape_cast %387 : vector<1x1x64xf32> to vector<1x64xf32>
    %389 = vector.broadcast %388 : vector<1x64xf32> to vector<16x64xf32>
    %390 = arith.addf %386, %389 : vector<16x64xf32>
    %cst_142 = arith.constant 5.000000e-01 : f32
    %391 = vector.broadcast %cst_142 : f32 to vector<16x64xf32>
    %392 = arith.mulf %391, %390 : vector<16x64xf32>
    %cst_143 = arith.constant 4.471500e-02 : f32
    %393 = vector.broadcast %cst_143 : f32 to vector<16x64xf32>
    %394 = arith.mulf %393, %390 : vector<16x64xf32>
    %395 = arith.mulf %394, %390 : vector<16x64xf32>
    %396 = arith.mulf %395, %390 : vector<16x64xf32>
    %397 = arith.addf %390, %396 : vector<16x64xf32>
    %cst_144 = arith.constant 0.797884583 : f32
    %398 = vector.broadcast %cst_144 : f32 to vector<16x64xf32>
    %399 = arith.mulf %398, %397 : vector<16x64xf32>
    %400 = math.tanh %399 : vector<16x64xf32>
    %cst_145 = arith.constant 1.000000e+00 : f32
    %401 = vector.broadcast %cst_145 : f32 to vector<16x64xf32>
    %402 = arith.addf %401, %400 : vector<16x64xf32>
    %403 = arith.mulf %392, %402 : vector<16x64xf32>
    %c1_146 = arith.constant 1 : index
    %c0_147 = arith.constant 0 : index
    %c0_148 = arith.constant 0 : index
    %404 = vector.load %arg14[%c1_146, %c0_147, %c0_148] : memref<2x64x32xf32, #tpu.memory_space<vmem>>, vector<1x64x32xf32>
    %405 = vector.shape_cast %404 : vector<1x64x32xf32> to vector<64x32xf32>
    %406 = arith.truncf %403 : vector<16x64xf32> to vector<16x64xbf16>
    %407 = arith.truncf %405 : vector<64x32xf32> to vector<64x32xbf16>
    %cst_149 = arith.constant dense<0.000000e+00> : vector<16x32xf32>
    %408 = tpu.matmul %406, %407, %cst_149 {dimension_numbers = #tpu.dot_dimension_numbers<[1], [0], [0], [1], [0, 0, 1, 1], [], []>} : vector<16x64xbf16>, vector<64x32xbf16>, vector<16x32xf32> -> vector<16x32xf32>
    %c1_150 = arith.constant 1 : index
    %c0_151 = arith.constant 0 : index
    %c0_152 = arith.constant 0 : index
    %409 = vector.load %arg15[%c1_150, %c0_151, %c0_152] : memref<2x1x32xf32, #tpu.memory_space<vmem>>, vector<1x1x32xf32>
    %410 = vector.shape_cast %409 : vector<1x1x32xf32> to vector<1x32xf32>
    %411 = vector.broadcast %410 : vector<1x32xf32> to vector<16x32xf32>
    %412 = arith.addf %408, %411 : vector<16x32xf32>
    %413 = arith.addf %381, %412 : vector<16x32xf32>
    %c1_153 = arith.constant 1 : index
    %c0_154 = arith.constant 0 : index
    %c0_155 = arith.constant 0 : index
    %414 = vector.load %arg16[%c1_153, %c0_154, %c0_155] : memref<2x1x32xf32, #tpu.memory_space<vmem>>, vector<1x1x32xf32>
    %415 = vector.shape_cast %414 : vector<1x1x32xf32> to vector<1x32xf32>
    %c1_156 = arith.constant 1 : index
    %c0_157 = arith.constant 0 : index
    %c0_158 = arith.constant 0 : index
    %416 = vector.load %arg17[%c1_156, %c0_157, %c0_158] : memref<2x1x32xf32, #tpu.memory_space<vmem>>, vector<1x1x32xf32>
    %417 = vector.shape_cast %416 : vector<1x1x32xf32> to vector<1x32xf32>
    %cst_159 = arith.constant dense<0.000000e+00> : vector<16xf32>
    %418 = vector.multi_reduction <add>, %413, %cst_159 [1] : vector<16x32xf32> to vector<16xf32>
    %419 = vector.shape_cast %418 : vector<16xf32> to vector<16x1xf32>
    %cst_160 = arith.constant 3.200000e+01 : f32
    %420 = vector.broadcast %cst_160 : f32 to vector<16x1xf32>
    %421 = arith.divf %419, %420 : vector<16x1xf32>
    %422 = vector.broadcast %421 : vector<16x1xf32> to vector<16x32xf32>
    %423 = arith.subf %413, %422 : vector<16x32xf32>
    %424 = arith.mulf %423, %423 : vector<16x32xf32>
    %cst_161 = arith.constant dense<0.000000e+00> : vector<16xf32>
    %425 = vector.multi_reduction <add>, %424, %cst_161 [1] : vector<16x32xf32> to vector<16xf32>
    %426 = vector.shape_cast %425 : vector<16xf32> to vector<16x1xf32>
    %cst_162 = arith.constant 3.200000e+01 : f32
    %427 = vector.broadcast %cst_162 : f32 to vector<16x1xf32>
    %428 = arith.divf %426, %427 : vector<16x1xf32>
    %429 = vector.broadcast %421 : vector<16x1xf32> to vector<16x32xf32>
    %430 = arith.subf %413, %429 : vector<16x32xf32>
    %cst_163 = arith.constant 9.99999996E-13 : f32
    %431 = vector.broadcast %cst_163 : f32 to vector<16x1xf32>
    %432 = arith.addf %428, %431 : vector<16x1xf32>
    %433 = math.rsqrt %432 : vector<16x1xf32>
    %434 = vector.broadcast %433 : vector<16x1xf32> to vector<16x32xf32>
    %435 = arith.mulf %430, %434 : vector<16x32xf32>
    %436 = vector.broadcast %415 : vector<1x32xf32> to vector<16x32xf32>
    %437 = arith.mulf %435, %436 : vector<16x32xf32>
    %438 = vector.broadcast %417 : vector<1x32xf32> to vector<16x32xf32>
    %439 = arith.addf %437, %438 : vector<16x32xf32>
    %c0_164 = arith.constant 0 : index
    %c0_165 = arith.constant 0 : index
    %440 = vector.load %arg2[%c0_164, %c0_165] : memref<2x16xf32, #tpu.memory_space<vmem>>, vector<2x16xf32>
    %cst_166 = arith.constant dense<0.000000e+00> : vector<2x32xf32>
    %441 = tpu.matmul %440, %439, %cst_166 {dimension_numbers = #tpu.dot_dimension_numbers<[1], [0], [0], [1], [0, 0, 1, 1], [], []>} : vector<2x16xf32>, vector<16x32xf32>, vector<2x32xf32> -> vector<2x32xf32>
    %c0_167 = arith.constant 0 : index
    %c0_168 = arith.constant 0 : index
    %442 = vector.load %arg18[%c0_167, %c0_168] : memref<32x32xf32, #tpu.memory_space<vmem>>, vector<32x32xf32>
    %443 = arith.truncf %441 : vector<2x32xf32> to vector<2x32xbf16>
    %444 = arith.truncf %442 : vector<32x32xf32> to vector<32x32xbf16>
    %cst_169 = arith.constant dense<0.000000e+00> : vector<2x32xf32>
    %445 = tpu.matmul %443, %444, %cst_169 {dimension_numbers = #tpu.dot_dimension_numbers<[1], [0], [0], [1], [0, 0, 1, 1], [], []>} : vector<2x32xbf16>, vector<32x32xbf16>, vector<2x32xf32> -> vector<2x32xf32>
    %c0_170 = arith.constant 0 : index
    %c0_171 = arith.constant 0 : index
    %446 = vector.load %arg19[%c0_170, %c0_171] : memref<1x32xf32, #tpu.memory_space<vmem>>, vector<1x32xf32>
    %447 = vector.broadcast %446 : vector<1x32xf32> to vector<2x32xf32>
    %448 = arith.addf %445, %447 : vector<2x32xf32>
    %449 = math.tanh %448 : vector<2x32xf32>
    %c0_172 = arith.constant 0 : index
    %c0_173 = arith.constant 0 : index
    %450 = vector.load %arg20[%c0_172, %c0_173] : memref<32x128xf32, #tpu.memory_space<vmem>>, vector<32x128xf32>
    %451 = arith.truncf %449 : vector<2x32xf32> to vector<2x32xbf16>
    %452 = arith.truncf %450 : vector<32x128xf32> to vector<32x128xbf16>
    %cst_174 = arith.constant dense<0.000000e+00> : vector<2x128xf32>
    %453 = tpu.matmul %451, %452, %cst_174 {dimension_numbers = #tpu.dot_dimension_numbers<[1], [0], [0], [1], [0, 0, 1, 1], [], []>} : vector<2x32xbf16>, vector<32x128xbf16>, vector<2x128xf32> -> vector<2x128xf32>
    %c0_175 = arith.constant 0 : index
    %c0_176 = arith.constant 0 : index
    %454 = vector.load %arg21[%c0_175, %c0_176] : memref<1x128xf32, #tpu.memory_space<vmem>>, vector<1x128xf32>
    %455 = vector.broadcast %454 : vector<1x128xf32> to vector<2x128xf32>
    %456 = arith.addf %453, %455 : vector<2x128xf32>
    %cst_177 = arith.constant 0.000000e+00 : f32
    %457 = vector.broadcast %cst_177 : f32 to vector<2x128xf32>
    %458 = arith.subf %457, %456 : vector<2x128xf32>
    %459 = math.exp %458 : vector<2x128xf32>
    %cst_178 = arith.constant 1.000000e+00 : f32
    %460 = vector.broadcast %cst_178 : f32 to vector<2x128xf32>
    %461 = arith.addf %460, %459 : vector<2x128xf32>
    %cst_179 = arith.constant 1.000000e+00 : f32
    %462 = vector.broadcast %cst_179 : f32 to vector<2x128xf32>
    %463 = arith.divf %462, %461 : vector<2x128xf32>
    %c0_180 = arith.constant 0 : index
    %c0_181 = arith.constant 0 : index
    %464 = vector.load %arg22[%c0_180, %c0_181] : memref<2x128xf32, #tpu.memory_space<vmem>>, vector<2x128xf32>
    tpu.vector_store %arg22[%c0_180, %c0_181], %463 {strides = array<i32>} : memref<2x128xf32, #tpu.memory_space<vmem>>, vector<2x128xf32>,
    %c0_182 = arith.constant 0 : index
    %c0_183 = arith.constant 0 : index
    %465 = vector.load %arg3[%c0_182, %c0_183] : memref<2x128xf32, #tpu.memory_space<vmem>>, vector<2x128xf32>
    %466 = tpu.iota {dimensions = array<i32: 1>} : vector<2x128xi32>
    %c6_i32 = arith.constant 6 : i32
    %467 = vector.broadcast %c6_i32 : i32 to vector<2x128xi32>
    %468 = arith.cmpi slt, %466, %467 : vector<2x128xi32>
    %469 = math.log %463 : vector<2x128xf32>
    %cst_184 = arith.constant -1.000000e+02 : f32
    %470 = vector.broadcast %cst_184 : f32 to vector<2x128xf32>
    %471 = arith.maximumf %469, %470 : vector<2x128xf32>
    %cst_185 = arith.constant 1.000000e+00 : f32
    %472 = vector.broadcast %cst_185 : f32 to vector<2x128xf32>
    %473 = arith.subf %472, %463 : vector<2x128xf32>
    %474 = math.log %473 : vector<2x128xf32>
    %cst_186 = arith.constant -1.000000e+02 : f32
    %475 = vector.broadcast %cst_186 : f32 to vector<2x128xf32>
    %476 = arith.maximumf %474, %475 : vector<2x128xf32>
    %477 = arith.mulf %465, %471 : vector<2x128xf32>
    %cst_187 = arith.constant 1.000000e+00 : f32
    %478 = vector.broadcast %cst_187 : f32 to vector<2x128xf32>
    %479 = arith.subf %478, %465 : vector<2x128xf32>
    %480 = arith.mulf %479, %476 : vector<2x128xf32>
    %481 = arith.addf %477, %480 : vector<2x128xf32>
    %cst_188 = arith.constant 0.000000e+00 : f32
    %482 = vector.broadcast %cst_188 : f32 to vector<2x128xf32>
    %483 = arith.subf %482, %481 : vector<2x128xf32>
    %cst_189 = arith.constant 0.000000e+00 : f32
    %484 = vector.broadcast %cst_189 : f32 to vector<2x128xf32>
    %485 = arith.select %468, %483, %484 : vector<2x128xi1>, vector<2x128xf32>
    %486 = vector.shape_cast %485 : vector<2x128xf32> to vector<1x2x128xf32>
    %cst_190 = arith.constant dense<0.000000e+00> : vector<1xf32>
    %487 = vector.multi_reduction <add>, %486, %cst_190 [1, 2] : vector<1x2x128xf32> to vector<1xf32>
    %488 = vector.shape_cast %487 : vector<1xf32> to vector<1x1x1xf32>
    %489 = vector.extract %488[0, 0, 0] : f32 from vector<1x1x1xf32>
    %cst_191 = arith.constant 1.200000e+01 : f32
    %490 = arith.divf %489, %cst_191 : f32
    %491 = vector.broadcast %490 : f32 to vector<1x1xf32>
    %c0_192 = arith.constant 0 : index
    %c0_193 = arith.constant 0 : index
    %492 = vector.load %arg23[%c0_192, %c0_193] : memref<1x1xf32, #tpu.memory_space<vmem>>, vector<1x1xf32>
    tpu.vector_store %arg23[%c0_192, %c0_193], %491 {strides = array<i32>} : memref<1x1xf32, #tpu.memory_space<vmem>>, vector<1x1xf32>,
    return
  }
}

</mosaic_0001>

<bundles_post_ra>
// kernel: text_tagger_forward.1
= control target key start
LH: loop header
LB: loop body
LE: loop exit
PB: predicated region body
PF: predicated region fallthrough
CT: control target
= control target key end

     0   :  { %s3675_s0 = inlined_call_operand.vmem [shape: f32[16,32], index: 0, kind: input, shape index: {}]   ;;  %s3676_s1 = inlined_call_operand.vmem [shape: f32[16,16], index: 1, kind: input, shape index: {}]   ;;  %s3677_s2 = inlined_call_operand.vmem [shape: f32[2,16], index: 2, kind: input, shape index: {}]   ;;  %s3678_s3 = inlined_call_operand.vmem [shape: f32[2,128], index: 3, kind: input, shape index: {}]   ;;  %s3679_s4 = inlined_call_operand.vmem [shape: f32[1,32], index: 4, kind: input, shape index: {}]   ;;  %s3680_s5 = inlined_call_operand.vmem [shape: f32[1,32], index: 5, kind: input, shape index: {}]   ;;  %s3681_s6 = inlined_call_operand.vmem [shape: f32[2,32,96], index: 6, kind: input, shape index: {}]   ;;  %s3682_s7 = inlined_call_operand.vmem [shape: f32[2,1,96], index: 7, kind: input, shape index: {}]   ;;  %s3683_s8 = inlined_call_operand.vmem [shape: f32[2,32,32], index: 8, kind: input, shape index: {}]   ;;  %s3684_s9 = inlined_call_operand.vmem [shape: f32[2,1,32], index: 9, kind: input, shape index: {}]   ;;  %s3685_s10 = inlined_call_operand.vmem [shape: f32[2,1,32], index: 10, kind: input, shape index: {}]   ;;  %s3686_s11 = inlined_call_operand.vmem [shape: f32[2,1,32], index: 11, kind: input, shape index: {}]   ;;  %s3687_s12 = inlined_call_operand.vmem [shape: f32[2,32,64], index: 12, kind: input, shape index: {}]   ;;  %s3688_s13 = inlined_call_operand.vmem [shape: f32[2,1,64], index: 13, kind: input, shape index: {}]   ;;  %s3689_s14 = inlined_call_operand.vmem [shape: f32[2,64,32], index: 14, kind: input, shape index: {}]   ;;  %s3690_s15 = inlined_call_operand.vmem [shape: f32[2,1,32], index: 15, kind: input, shape index: {}]   ;;  %s3691_s16 = inlined_call_operand.vmem [shape: f32[2,1,32], index: 16, kind: input, shape index: {}]   ;;  %s3692_s17 = inlined_call_operand.vmem [shape: f32[2,1,32], index: 17, kind: input, shape index: {}]   ;;  %s3693_s18 = inlined_call_operand.vmem [shape: f32[32,32], index: 18, kind: input, shape index: {}]   ;;  %s3694_s19 = inlined_call_operand.vmem [shape: f32[1,32], index: 19, kind: input, shape index: {}]   ;;  %s3695_s20 = inlined_call_operand.vmem [shape: f32[32,128], index: 20, kind: input, shape index: {}]   ;;  %s3696_s21 = inlined_call_operand.vmem [shape: f32[1,128], index: 21, kind: input, shape index: {}]   ;;  %s3697_s22 = inlined_call_operand.hbm [shape: f32[2,128], index: 22, kind: output, shape index: {0}]   ;;  %s3698_s23 = inlined_call_operand.hbm [shape: f32[1,1], index: 23, kind: output, shape index: {1}]  }
   0x1   :  { %3711 = sst [smem:[#allocation8_spill]] %s3675_s0 }
   0x2   :  { %3712 = sst [smem:[#allocation9_spill]] %s3676_s1 }
   0x3   :  { %3713 = sst [smem:[#allocation10_spill]] %s3677_s2 }
   0x4   :  { %3714 = sst [smem:[#allocation11_spill]] %s3678_s3 }
   0x5   :  { %3715 = sst [smem:[#allocation12_spill]] %s3679_s4 }
   0x6   :  { %3716 = sst [smem:[#allocation13_spill]] %s3680_s5 }
   0x7   :  { %3717 = sst [smem:[#allocation14_spill]] %s3681_s6 }
   0x8   :  { %3718 = sst [smem:[#allocation15_spill]] %s3682_s7 }
   0x9   :  { %29 = vsyncpa [#allocation3], 0  ;;  %s3719_s24 = sld [smem:[#allocation8_spill]]  ;;  %vm82_vm0 = vcmask 261120  }
   0xf   :  { %v78_v0 = vld [vmem:[%s3719_s24] sm:$0xff]  ;;  %v79_v1 = vld [vmem:[%s3719_s24 + $0x8] sm:$0xff] }
  0x10   :  { %30 = vsyncpa [#allocation5], 0  ;;  %v83_v2 = vsel %vm82_vm0, %v78_v0, 0.0  ;;  %v86_v3 = vsel %vm82_vm0, %v79_v1, 0.0  ;;  %s3720_s2 = sld [smem:[#allocation14_spill]]  ;;  %v2962_v17 = vmov 0.0  }
  0x11   :  { %84 = vadd.xlane.f32.xlu0 %v83_v2  ;;  %2566 = vmatprep.subr.bf16.mxu0 %v2962_v17  ;;  %vm2963_vm1 = vmmov 0   ;;  %s3721_s30 = sld [smem:[#allocation12_spill]]  ;;  %s3722_s5 = sld [smem:[#allocation13_spill]]  ;;  %vm192_vm2 = vcmask 64512   ;;  %vm244_vm3 = vcmask 130048   ;;  %vm447_vm4 = vcmask 1043456  }
  0x12   :  { %2574 = vmatprep.subr.bf16.mxu1 %v2962_v17  ;;  %2570 = vmatprep.mubr.msk.bf16.mxu0 %vm2963_vm1, %v2962_v17  ;;  %s3723_s6 = sld [smem:[#allocation15_spill]]  ;;  %s2964_s27 = smov 88   ;;  %vm1042_vm5 = vcmask 523264   ;;  %vm2361_vm7 = vcmask 1041408  }
  0x13   :  { %2576 = vmatprep.mubr.msk.bf16.mxu1 %vm2963_vm1, %v2962_v17  ;;  %s2965_s7 = smov 96   ;;  %s2966_s28 = smov 120  }
  0x14   :  { %s3724_s0 = sld [smem:[#allocation9_spill]]  ;;  %s3708_s24 = smov 64  }
  0x15   :  { %87 = vadd.xlane.f32.xlu0 %v86_v3  ;;  %s3707_s25 = smov 80   ;;  %s3710_s1 = smov 56  }
  0x16   :  { %v126_v14 = vld [vmem:[%s3720_s2] sm:$0xff]  ;;  %v127_v15 = vld [vmem:[%s3720_s2 + $0x8] sm:$0xff]  ;;  %v128_v18 = vld [vmem:[%s3720_s2 + $0x10] sm:$0xff]  ;;  %s3705_s26 = smov 104   ;;  %s3706_s29 = smov 72  }
  0x17   :  { %v131_v16 = vpack.c.bf16 %v127_v15, %v126_v14  ;;  %v129_v19 = vld [vmem:[%s3720_s2 + $0x18] sm:$0xff]  ;;  %v2406_v29 = vld [vmem:[%s3721_s30] ss:$0 sm:$0xff]  ;;  %s3704_s30 = smov 48   ;;  %s3703_s3 = smov 40  }
  0x18   :  { %v132_v20 = vpack.c.bf16 %v129_v19, %v128_v18  ;;  %v2407_v33 = vld [vmem:[%s3722_s5] ss:$0 sm:$0xff]  ;;  %s3709_s5 = smov 112  }
  0x19   :  { %2567 = vmatpush3.bf16.msra.mxu0 %v131_v16  ;;  %v2408_v38 = vld [vmem:[%s3723_s6] ss:$0 sm:$0xff] }
  0x1a   :  { %2568 = vmatprep.subr.bf16.mxu0 %v2962_v17  ;;  %v3168_v52 = vld [vmem:[%s3724_s0] sm:$0xff]  ;;  %v3173_v56 = vld [vmem:[%s3724_s0 + $0x8] sm:$0xff] }
  0x1d   :  { %2569 = vmatpush3.bf16.msra.mxu0 %v132_v20 }
  0x1e   :  { %2580 = vmatprep.subr.bf16.mxu0 %v2962_v17 }
  0x9e   :  { %v85_v4 = vpop.xlane.xlu0 %84 }
  0x9f   :  { %v90_v5 = vmul.f32 0.03125, %v85_v4 }
  0xa1   :  { %v92_v6 = vsub.f32 %v78_v0, %v90_v5 }
  0xa2   :  { %v88_v7 = vpop.xlane.xlu0 %87 }
  0xa3   :  { %v91_v8 = vmul.f32 0.03125, %v88_v7  ;;  %v94_v9 = vmul.f32 %v92_v6, %v92_v6 }
  0xa5   :  { %v93_v10 = vsub.f32 %v79_v1, %v91_v8  ;;  %v96_v11 = vsel %vm82_vm0, %v94_v9, 0.0 }
  0xa6   :  { %97 = vadd.xlane.f32.xlu1 %v96_v11 }
  0xa7   :  { %v95_v12 = vmul.f32 %v93_v10, %v93_v10 }
  0xa9   :  { %v99_v13 = vsel %vm82_vm0, %v95_v12, 0.0 }
  0xaa   :  { %100 = vadd.xlane.f32.xlu1 %v99_v13 }
 0x133   :  { %v98_v21 = vpop.xlane.xlu1 %97 }
 0x134   :  { %v102_v22 = vmul.f32 0.03125, %v98_v21 }
 0x136   :  { %v104_v23 = vadd.f32 1e-12, %v102_v22 }
 0x137   :  { %v101_v24 = vpop.xlane.xlu1 %100 }
 0x138   :  { %2810 = vrsqrt.f32 %v104_v23  ;;  %v103_v25 = vmul.f32 0.03125, %v101_v24 }
 0x13a   :  { %v105_v26 = vadd.f32 1e-12, %v103_v25 }
 0x13c   :  { %2812 = vrsqrt.f32 %v105_v26 }
 0x142   :  { %v2811_v27 = vpop.eup %2810 }
 0x143   :  { %v108_v28 = vmul.f32 %v2811_v27, %v92_v6 }
 0x145   :  { %v116_v32 = vmul.f32 %v2406_v29, %v108_v28 }
 0x146   :  { %v2813_v30 = vpop.eup %2812 }
 0x147   :  { %v109_v31 = vmul.f32 %v2813_v30, %v93_v10  ;;  %v3134_v35 = vadd.f32 %v2407_v33, %v116_v32 }
 0x149   :  { %v117_v34 = vmul.f32 %v2406_v29, %v109_v31 }
 0x14b   :  { %v3136_v36 = vadd.f32 %v2407_v33, %v117_v34 }
 0x14d   :  { %v130_v37 = vpack.c.bf16 %v3136_v36, %v3134_v35 }
 0x14f   :  { %2571 = vmatmul.mubr.msk.bf16.vlgmr.msra.gmra.mrb[0].mxu0 %vm82_vm0, %v130_v37 }
 0x150   :  { %2582 = vmatprep.mubr.msk.bf16.mxu0 %vm2963_vm1, %v2962_v17 }
 0x222   :  { %v177_v39 = vpop.f32.mrb[0].mxu0 }
 0x223   :  { %v2572_v40 = vpop.f32.mrb[1].mxu0  ;;  %v178_v42 = vadd.f32 %v2408_v38, %v177_v39 }
 0x224   :  { %v180_v41 = vpop.f32.mrb[2].mxu0 }
 0x225   :  { %v181_v43 = vadd.f32 %v2408_v38, %v180_v41  ;;  %v2573_v44 = vpop.f32.mrb[3].mxu0 }
 0x227   :  { %v3146_v45 = vpack.c.bf16 %v181_v43, %v178_v42 }
 0x229   :  { %319 = vrot.lane.b32.xlu1 %v3146_v45, %s2964_s27  ;;  %190 = vrot.lane.b32.xlu0 %v3146_v45, %s2965_s7 }
 0x22d   :  { %317 = vrot.lane.b32.xlu1 %v3146_v45, %s2966_s28 }
 0x29b   :  { %v191_v46 = vpop.permute.xlu0 %190  ;;  %v320_v48 = vpop.permute.xlu1 %319 }
 0x29c   :  { %v197_v47 = vsel %vm192_vm2, %v191_v46, 0  ;;  %v325_v49 = vsel %vm192_vm2, %v320_v48, 0 }
 0x29d   :  { %2575 = vmatpush3.bf16.xpose.msra.mxu1 %v197_v47 }
 0x29e   :  { %2586 = vmatprep.subr.bf16.mxu1 %v2962_v17 }
 0x29f   :  { %v318_v50 = vpop.permute.xlu1 %317 }
 0x2a4   :  { %2577 = vmatmul.mubr.msk.bf16.vlgmr.msra.gmra.mrb[0].mxu1 %vm192_vm2, %v3146_v45 }
 0x2a5   :  { %2587 = vmatpush3.bf16.xpose.msra.mxu1 %v325_v49  ;;  %2588 = vmatprep.mubr.msk.bf16.mxu1 %vm2963_vm1, %v2962_v17  ;;  %v184_v49 = vld [vmem:[%s3683_s8] sm:$0xff] }
 0x2a6   :  { %2598 = vmatprep.subr.bf16.mxu1 %v2962_v17 }
 0x2ac   :  { %2589 = vmatmul.mubr.msk.bf16.vlgmr.msra.gmra.mrb[4].mxu1 %vm192_vm2, %v318_v50  ;;  %v316_v50 = vpack.c.bf16 %v184_v49, %v184_v49 }
 0x2ad   :  { %2600 = vmatprep.mubr.msk.bf16.mxu1 %vm2963_vm1, %v2962_v17 }
 0x377   :  { %v233_v51 = vpop.f32.mrb[0].mxu1 }
 0x378   :  { %v240_v53 = vmul.f32 0.35355338, %v233_v51  ;;  %v2578_v54 = vpop.f32.mrb[1].mxu1  ;;  %v496_v51 = vsel %vm447_vm4, %v316_v50, 0 }
 0x379   :  { %v236_v55 = vpop.f32.mrb[2].mxu1 }
 0x37a   :  { %v241_v57 = vmul.f32 0.35355338, %v236_v55  ;;  %v2579_v58 = vpop.f32.mrb[3].mxu1  ;;  %v242_v59 = vadd.f32 %v240_v53, %v3168_v52  ;;  %v185_v53 = vld [vmem:[%s3683_s8 + $0x8] sm:$0xff] }
 0x37b   :  { %v443_v54 = vpack.c.bf16 %v185_v53, %v185_v53 }
 0x37c   :  { %v245_v60 = vsel %vm244_vm3, %v242_v59, -inf  ;;  %v243_v61 = vadd.f32 %v241_v57, %v3173_v56 }
 0x37d   :  { %246 = vmax.xlane.f32.xlu1 %v245_v60  ;;  %v449_v55 = vsel %vm447_vm4, %v443_v54, 0 }
 0x37e   :  { %v248_v62 = vsel %vm244_vm3, %v243_v61, -inf  ;;  %2599 = vmatpush3.bf16.msra.mxu1 %v449_v55 }
 0x37f   :  { %v361_v63 = vpop.f32.mrb[4].mxu1  ;;  %249 = vmax.xlane.f32.xlu0 %v248_v62  ;;  %2610 = vmatprep.subr.bf16.mxu1 %v2962_v17 }
 0x380   :  { %v368_v0 = vmul.f32 0.35355338, %v361_v63  ;;  %v2590_v1 = vpop.f32.mrb[5].mxu1 }
 0x381   :  { %v364_v2 = vpop.f32.mrb[6].mxu1 }
 0x382   :  { %v369_v3 = vmul.f32 0.35355338, %v364_v2  ;;  %v2591_v4 = vpop.f32.mrb[7].mxu1  ;;  %v370_v5 = vadd.f32 %v368_v0, %v3168_v52 }
 0x384   :  { %v372_v6 = vsel %vm244_vm3, %v370_v5, -inf  ;;  %v371_v7 = vadd.f32 %v369_v3, %v3173_v56 }
 0x385   :  { %373 = vmax.xlane.f32.xlu0 %v372_v6 }
 0x386   :  { %v375_v8 = vsel %vm244_vm3, %v371_v7, -inf }
 0x389   :  { %376 = vmax.xlane.f32.xlu0 %v375_v8 }
 0x40a   :  { %v247_v9 = vpop.xlane.xlu1 %246 }
 0x40b   :  { %v251_v10 = vsub.f32 %v242_v59, %v247_v9 }
 0x40c   :  { %v250_v11 = vpop.xlane.xlu0 %249 }
 0x40d   :  { %v253_v12 = vmul.f32 1.442695, %v251_v10  ;;  %v252_v13 = vsub.f32 %v243_v61, %v250_v11 }
 0x40f   :  { %2814 = vpow2.f32 %v253_v12  ;;  %v255_v14 = vmul.f32 1.442695, %v252_v13 }
 0x411   :  { %2816 = vpow2.f32 %v255_v14 }
 0x412   :  { %v374_v15 = vpop.xlane.xlu0 %373 }
 0x413   :  { %v378_v16 = vsub.f32 %v370_v5, %v374_v15 }
 0x415   :  { %v380_v18 = vmul.f32 1.442695, %v378_v16 }
 0x416   :  { %v377_v19 = vpop.xlane.xlu0 %376 }
 0x417   :  { %2818 = vpow2.f32 %v380_v18  ;;  %v379_v20 = vsub.f32 %v371_v7, %v377_v19 }
 0x419   :  { %v2815_v21 = vpop.eup %2814  ;;  %v382_v22 = vmul.f32 1.442695, %v379_v20 }
 0x41a   :  { %v257_v23 = vsel %vm244_vm3, %v2815_v21, 0.0 }
 0x41b   :  { %v2817_v24 = vpop.eup %2816  ;;  %2820 = vpow2.f32 %v382_v22  ;;  %258 = vadd.xlane.f32.xlu1 %v257_v23 }
 0x41c   :  { %v260_v25 = vsel %vm244_vm3, %v2817_v24, 0.0 }
 0x41d   :  { %261 = vadd.xlane.f32.xlu0 %v260_v25 }
 0x421   :  { %v2819_v26 = vpop.eup %2818 }
 0x422   :  { %v384_v27 = vsel %vm244_vm3, %v2819_v26, 0.0 }
 0x423   :  { %385 = vadd.xlane.f32.xlu1 %v384_v27 }
 0x425   :  { %v2821_v28 = vpop.eup %2820 }
 0x426   :  { %v387_v29 = vsel %vm244_vm3, %v2821_v28, 0.0 }
 0x427   :  { %388 = vadd.xlane.f32.xlu0 %v387_v29 }
 0x434   :  { %268 = vrot.lane.b32.xlu1 %v3146_v45, %s3708_s24 }
 0x438   :  { %541 = vrot.lane.b32.xlu1 %v3146_v45, %s3707_s25  ;;  %s3729_s25 = smov 72  }
 0x43c   :  { %539 = vrot.lane.b32.xlu1 %v3146_v45, %s3709_s5 }
 0x43d   :  { %395 = vrot.lane.b32.xlu0 %v3146_v45, %s3710_s1  ;;  %s3733_s1 = sld [smem:[#allocation10_spill]] }
 0x4a8   :  { %v259_v30 = vpop.xlane.xlu1 %258 }
 0x4a9   :  { %2822 = vrcp.f32 %v259_v30 }
 0x4aa   :  { %v262_v31 = vpop.xlane.xlu0 %261 }
 0x4ab   :  { %2824 = vrcp.f32 %v262_v31 }
 0x4b0   :  { %v386_v32 = vpop.xlane.xlu1 %385 }
 0x4b1   :  { %2826 = vrcp.f32 %v386_v32 }
 0x4b3   :  { %v2823_v33 = vpop.eup %2822 }
 0x4b4   :  { %v389_v34 = vpop.xlane.xlu0 %388  ;;  %v269_v37 = vpop.permute.xlu1 %268  ;;  %v265_v39 = vmul.f32 %v2823_v33, %v2815_v21 }
 0x4b5   :  { %v2825_v38 = vpop.eup %2824  ;;  %2828 = vrcp.f32 %v389_v34  ;;  %2581 = vmatpush3.bf16.msra.mxu0 %v269_v37 }
 0x4b6   :  { %v266_v40 = vmul.f32 %v2825_v38, %v2817_v24  ;;  %2592 = vmatprep.subr.bf16.mxu0 %v2962_v17 }
 0x4b8   :  { %v396_v41 = vpop.permute.xlu0 %395  ;;  %v267_v42 = vpack.c.bf16 %v266_v40, %v265_v39  ;;  %v542_v0 = vpop.permute.xlu1 %541 }
 0x4b9   :  { %v547_v4 = vsel %vm192_vm2, %v542_v0, 0 }
 0x4ba   :  { %2583 = vmatmul.mubr.msk.bf16.vlgmr.msra.gmra.mrb[4].mxu0 %vm244_vm3, %v267_v42 }
 0x4bb   :  { %2593 = vmatpush3.bf16.msra.mxu0 %v396_v41  ;;  %2594 = vmatprep.mubr.msk.bf16.mxu0 %vm2963_vm1, %v2962_v17  ;;  %v2827_v43 = vpop.eup %2826 }
 0x4bc   :  { %2604 = vmatprep.subr.bf16.mxu0 %v2962_v17  ;;  %v392_v46 = vmul.f32 %v2827_v43, %v2819_v26  ;;  %v540_v5 = vpop.permute.xlu1 %539 }
 0x4bf   :  { %v2829_v44 = vpop.eup %2828 }
 0x4c0   :  { %v393_v47 = vmul.f32 %v2829_v44, %v2821_v28 }
 0x4c2   :  { %v394_v48 = vpack.c.bf16 %v393_v47, %v392_v46 }
 0x4c4   :  { %2595 = vmatmul.mubr.msk.bf16.vlgmr.msra.gmra.mrb[8].mxu0 %vm244_vm3, %v394_v48 }
 0x4c5   :  { %2606 = vmatprep.mubr.msk.bf16.mxu0 %vm2963_vm1, %v2962_v17  ;;  %2605 = vmatpush3.bf16.msra.mxu0 %v496_v51  ;;  %v186_v51 = vld [vmem:[%s3683_s8 + $0x10] sm:$0xff] }
 0x4c6   :  { %2616 = vmatprep.subr.bf16.mxu0 %v2962_v17  ;;  %v665_v53 = vpack.c.bf16 %v186_v51, %v186_v51 }
 0x4c8   :  { %v670_v54 = vsel %vm447_vm4, %v665_v53, 0 }
 0x58d   :  { %v308_v57 = vpop.f32.mrb[4].mxu0 }
 0x58e   :  { %v2584_v58 = vpop.f32.mrb[5].mxu0 }
 0x58f   :  { %v311_v59 = vpop.f32.mrb[6].mxu0 }
 0x590   :  { %v315_v60 = vpack.c.bf16 %v311_v59, %v308_v57  ;;  %v2585_v61 = vpop.f32.mrb[7].mxu0 }
 0x592   :  { %2607 = vmatmul.mubr.msk.bf16.vlgmr.msra.gmra.mrb[12].mxu0 %vm192_vm2, %v315_v60 }
 0x593   :  { %2618 = vmatprep.mubr.msk.bf16.mxu0 %vm2963_vm1, %v2962_v17 }
 0x597   :  { %v435_v62 = vpop.f32.mrb[8].mxu0 }
 0x598   :  { %v2596_v63 = vpop.f32.mrb[9].mxu0 }
 0x599   :  { %v438_v1 = vpop.f32.mrb[10].mxu0 }
 0x59a   :  { %v442_v2 = vpack.c.bf16 %v438_v1, %v435_v62  ;;  %v2597_v3 = vpop.f32.mrb[11].mxu0 }
 0x59c   :  { %2601 = vmatmul.mubr.msk.bf16.vlgmr.msra.gmra.mrb[8].mxu1 %vm192_vm2, %v442_v2 }
 0x59d   :  { %2611 = vmatpush3.bf16.xpose.msra.mxu1 %v547_v4  ;;  %2612 = vmatprep.mubr.msk.bf16.mxu1 %vm2963_vm1, %v2962_v17 }
 0x59e   :  { %2622 = vmatprep.subr.bf16.mxu1 %v2962_v17 }
 0x5a4   :  { %2613 = vmatmul.mubr.msk.bf16.vlgmr.msra.gmra.mrb[12].mxu1 %vm192_vm2, %v540_v5 }
 0x5a5   :  { %2624 = vmatprep.mubr.msk.bf16.mxu1 %vm2963_vm1, %v2962_v17  ;;  %2623 = vmatpush3.bf16.msra.mxu1 %v670_v54 }
 0x5a6   :  { %2634 = vmatprep.subr.bf16.mxu1 %v2962_v17 }
 0x665   :  { %v532_v6 = vpop.f32.mrb[12].mxu0 }
 0x666   :  { %v2608_v7 = vpop.f32.mrb[13].mxu0 }
 0x667   :  { %v535_v8 = vpop.f32.mrb[14].mxu0 }
 0x668   :  { %v2609_v9 = vpop.f32.mrb[15].mxu0 }
 0x66f   :  { %v485_v10 = vpop.f32.mrb[8].mxu1 }
 0x670   :  { %v3224_v11 = vadd.f32 %v532_v6, %v485_v10  ;;  %v2602_v12 = vpop.f32.mrb[9].mxu1 }
 0x671   :  { %v488_v13 = vpop.f32.mrb[10].mxu1 }
 0x672   :  { %v3226_v14 = vadd.f32 %v535_v8, %v488_v13  ;;  %v2603_v15 = vpop.f32.mrb[11].mxu1 }
 0x677   :  { %v583_v16 = vpop.f32.mrb[12].mxu1 }
 0x678   :  { %v590_v18 = vmul.f32 0.35355338, %v583_v16  ;;  %v2614_v19 = vpop.f32.mrb[13].mxu1 }
 0x679   :  { %v586_v20 = vpop.f32.mrb[14].mxu1 }
 0x67a   :  { %v591_v21 = vmul.f32 0.35355338, %v586_v20  ;;  %v2615_v22 = vpop.f32.mrb[15].mxu1  ;;  %v592_v23 = vadd.f32 %v590_v18, %v3168_v52 }
 0x67c   :  { %v594_v24 = vsel %vm244_vm3, %v592_v23, -inf  ;;  %v593_v25 = vadd.f32 %v591_v21, %v3173_v56 }
 0x67d   :  { %595 = vmax.xlane.f32.xlu1 %v594_v24 }
 0x67e   :  { %v597_v26 = vsel %vm244_vm3, %v593_v25, -inf }
 0x67f   :  { %598 = vmax.xlane.f32.xlu0 %v597_v26 }
 0x68e   :  { %617 = vrot.lane.b32.xlu1 %v3146_v45, %s3704_s30 }
 0x692   :  { %715 = vrot.lane.b32.xlu1 %v3146_v45, %s3705_s26  ;;  %s3730_s26 = smov 104  }
 0x70a   :  { %v596_v27 = vpop.xlane.xlu1 %595 }
 0x70b   :  { %v600_v28 = vsub.f32 %v592_v23, %v596_v27 }
 0x70c   :  { %v599_v29 = vpop.xlane.xlu0 %598 }
 0x70d   :  { %v602_v30 = vmul.f32 1.442695, %v600_v28  ;;  %v601_v31 = vsub.f32 %v593_v25, %v599_v29 }
 0x70e   :  { %v618_v32 = vpop.permute.xlu1 %617 }
 0x70f   :  { %2830 = vpow2.f32 %v602_v30  ;;  %v604_v33 = vmul.f32 1.442695, %v601_v31  ;;  %2617 = vmatpush3.bf16.msra.mxu0 %v618_v32 }
 0x710   :  { %2628 = vmatprep.subr.bf16.mxu0 %v2962_v17 }
 0x711   :  { %2832 = vpow2.f32 %v604_v33 }
 0x712   :  { %v716_v50 = vpop.permute.xlu1 %715 }
 0x719   :  { %v2831_v34 = vpop.eup %2830 }
 0x71a   :  { %v606_v37 = vsel %vm244_vm3, %v2831_v34, 0.0 }
 0x71b   :  { %v2833_v38 = vpop.eup %2832  ;;  %607 = vadd.xlane.f32.xlu0 %v606_v37 }
 0x71c   :  { %v609_v39 = vsel %vm244_vm3, %v2833_v38, 0.0 }
 0x71f   :  { %610 = vadd.xlane.f32.xlu0 %v609_v39 }
 0x735   :  { %717 = vrot.lane.b32.xlu0 %v3146_v45, %s3706_s29 }
 0x7a8   :  { %v608_v40 = vpop.xlane.xlu0 %607 }
 0x7a9   :  { %2834 = vrcp.f32 %v608_v40 }
 0x7ac   :  { %v611_v41 = vpop.xlane.xlu0 %610 }
 0x7ad   :  { %2836 = vrcp.f32 %v611_v41 }
 0x7b0   :  { %v718_v47 = vpop.permute.xlu0 %717 }
 0x7b1   :  { %v723_v49 = vsel %vm192_vm2, %v718_v47, 0 }
 0x7b3   :  { %v2835_v42 = vpop.eup %2834 }
 0x7b4   :  { %v614_v44 = vmul.f32 %v2835_v42, %v2831_v34  ;;  %v2422_v42 = vld [vmem:[%s3684_s9] ss:$0 sm:$0xff] }
 0x7b7   :  { %v2837_v43 = vpop.eup %2836 }
 0x7b8   :  { %v615_v46 = vmul.f32 %v2837_v43, %v2833_v38 }
 0x7ba   :  { %v616_v48 = vpack.c.bf16 %v615_v46, %v614_v44 }
 0x7bc   :  { %2619 = vmatmul.mubr.msk.bf16.vlgmr.msra.gmra.mrb[16].mxu0 %vm244_vm3, %v616_v48 }
 0x7bd   :  { %2629 = vmatpush3.bf16.xpose.msra.mxu0 %v723_v49  ;;  %2630 = vmatprep.mubr.msk.bf16.mxu0 %vm2963_vm1, %v2962_v17 }
 0x7be   :  { %2640 = vmatprep.subr.bf16.mxu0 %v2962_v17 }
 0x7c4   :  { %2631 = vmatmul.mubr.msk.bf16.vlgmr.msra.gmra.mrb[20].mxu0 %vm192_vm2, %v716_v50 }
 0x7c5   :  { %2642 = vmatprep.mubr.msk.bf16.mxu0 %vm2963_vm1, %v2962_v17 }
 0x88f   :  { %v657_v55 = vpop.f32.mrb[16].mxu0 }
 0x890   :  { %v2620_v57 = vpop.f32.mrb[17].mxu0 }
 0x891   :  { %v660_v58 = vpop.f32.mrb[18].mxu0 }
 0x892   :  { %v664_v59 = vpack.c.bf16 %v660_v58, %v657_v55  ;;  %v2621_v60 = vpop.f32.mrb[19].mxu0 }
 0x894   :  { %2625 = vmatmul.mubr.msk.bf16.vlgmr.msra.gmra.mrb[16].mxu1 %vm192_vm2, %v664_v59 }
 0x895   :  { %2636 = vmatprep.mubr.msk.bf16.mxu1 %vm2963_vm1, %v2962_v17 }
 0x897   :  { %v759_v61 = vpop.f32.mrb[20].mxu0 }
 0x898   :  { %v766_v62 = vmul.f32 0.35355338, %v759_v61  ;;  %v2632_v63 = vpop.f32.mrb[21].mxu0 }
 0x899   :  { %v762_v0 = vpop.f32.mrb[22].mxu0 }
 0x89a   :  { %v767_v1 = vmul.f32 0.35355338, %v762_v0  ;;  %v2633_v2 = vpop.f32.mrb[23].mxu0  ;;  %v768_v3 = vadd.f32 %v766_v62, %v3168_v52 }
 0x89b   :  { %v947_v2 = vld [vmem:[%s3687_s12 + $0x8] sm:$0xff] }
 0x89c   :  { %v770_v4 = vsel %vm244_vm3, %v768_v3, -inf  ;;  %v769_v5 = vadd.f32 %v767_v1, %v3173_v56 }
 0x89d   :  { %771 = vmax.xlane.f32.xlu1 %v770_v4  ;;  %v948_v4 = vld [vmem:[%s3687_s12 + $0x10] sm:$0xff] }
 0x89e   :  { %v773_v6 = vsel %vm244_vm3, %v769_v5, -inf }
 0x89f   :  { %774 = vmax.xlane.f32.xlu0 %v773_v6 }
 0x92a   :  { %v772_v7 = vpop.xlane.xlu1 %771 }
 0x92b   :  { %v776_v8 = vsub.f32 %v768_v3, %v772_v7 }
 0x92c   :  { %v775_v9 = vpop.xlane.xlu0 %774 }
 0x92d   :  { %v778_v10 = vmul.f32 1.442695, %v776_v8  ;;  %v777_v12 = vsub.f32 %v769_v5, %v775_v9  ;;  %v949_v5 = vld [vmem:[%s3687_s12 + $0x18] sm:$0xff] }
 0x92e   :  { %v952_v6 = vpack.c.bf16 %v949_v5, %v948_v4 }
 0x92f   :  { %2838 = vpow2.f32 %v778_v10  ;;  %v780_v13 = vmul.f32 1.442695, %v777_v12 }
 0x931   :  { %2840 = vpow2.f32 %v780_v13 }
 0x939   :  { %v2839_v15 = vpop.eup %2838 }
 0x93a   :  { %v782_v16 = vsel %vm244_vm3, %v2839_v15, 0.0 }
 0x93b   :  { %v2841_v18 = vpop.eup %2840  ;;  %783 = vadd.xlane.f32.xlu0 %v782_v16 }
 0x93c   :  { %v785_v19 = vsel %vm244_vm3, %v2841_v18, 0.0 }
 0x93d   :  { %786 = vadd.xlane.f32.xlu1 %v785_v19 }
 0x951   :  { %793 = vrot.lane.b32.xlu0 %v3146_v45, %s3703_s3 }
 0x967   :  { %v706_v20 = vpop.f32.mrb[16].mxu1 }
 0x968   :  { %v713_v21 = vadd.f32 %v706_v20, %v3224_v11  ;;  %v2626_v22 = vpop.f32.mrb[17].mxu1  ;;  %v187_v11 = vld [vmem:[%s3683_s8 + $0x18] sm:$0xff] }
 0x969   :  { %v709_v23 = vpop.f32.mrb[18].mxu1  ;;  %v2424_v22 = vld [vmem:[%s3686_s11] ss:$0 sm:$0xff] }
 0x96a   :  { %v714_v24 = vadd.f32 %v709_v23, %v3226_v14  ;;  %v2627_v25 = vpop.f32.mrb[19].mxu1  ;;  %v841_v14 = vpack.c.bf16 %v187_v11, %v187_v11  ;;  %v1027_v11 = vld [vmem:[%s3689_s14 + $0x28] sm:$0xff] }
 0x96c   :  { %v846_v33 = vsel %vm447_vm4, %v841_v14, 0 }
 0x96d   :  { %2641 = vmatpush3.bf16.msra.mxu0 %v846_v33  ;;  %v1028_v33 = vld [vmem:[%s3689_s14 + $0x30] sm:$0xff] }
 0x96e   :  { %2654 = vmatprep.subr.bf16.mxu0 %v2962_v17 }
 0x9c8   :  { %v784_v26 = vpop.xlane.xlu0 %783 }
 0x9c9   :  { %2842 = vrcp.f32 %v784_v26 }
 0x9ca   :  { %v787_v27 = vpop.xlane.xlu1 %786 }
 0x9cb   :  { %2844 = vrcp.f32 %v787_v27  ;;  %v1022_v27 = vld [vmem:[%s3689_s14] sm:$0xff] }
 0x9cc   :  { %v794_v28 = vpop.permute.xlu0 %793 }
 0x9cd   :  { %2635 = vmatpush3.bf16.msra.mxu1 %v794_v28  ;;  %v1023_v28 = vld [vmem:[%s3689_s14 + $0x8] sm:$0xff] }
 0x9ce   :  { %2646 = vmatprep.subr.bf16.mxu1 %v2962_v17 }
 0x9d3   :  { %v2843_v29 = vpop.eup %2842 }
 0x9d4   :  { %v790_v31 = vmul.f32 %v2843_v29, %v2839_v15  ;;  %v1024_v29 = vld [vmem:[%s3689_s14 + $0x10] sm:$0xff] }
 0x9d5   :  { %v2845_v30 = vpop.eup %2844 }
 0x9d6   :  { %v791_v45 = vmul.f32 %v2845_v30, %v2841_v18  ;;  %v2423_v18 = vld [vmem:[%s3685_s10] ss:$0 sm:$0xff]  ;;  %v1031_v30 = vpack.c.bf16 %v1023_v28, %v1022_v27  ;;  %v2433_v28 = vld [vmem:[%s3720_s2 + $0x30] sm:$0xff] }
 0x9d8   :  { %v792_v32 = vpack.c.bf16 %v791_v45, %v790_v31  ;;  %v1025_v31 = vld [vmem:[%s3689_s14 + $0x18] sm:$0xff] }
 0x9d9   :  { %v1032_v45 = vpack.c.bf16 %v1025_v31, %v1024_v29  ;;  %v2434_v29 = vld [vmem:[%s3720_s2 + $0x38] sm:$0xff] }
 0x9da   :  { %2637 = vmatmul.mubr.msk.bf16.vlgmr.msra.gmra.mrb[20].mxu1 %vm244_vm3, %v792_v32  ;;  %v1026_v32 = vld [vmem:[%s3689_s14 + $0x20] sm:$0xff] }
 0x9db   :  { %2650 = vmatprep.mubr.msk.bf16.mxu1 %vm2963_vm1, %v2962_v17  ;;  %v1033_v14 = vpack.c.bf16 %v1027_v11, %v1026_v32 }
 0xaad   :  { %v833_v34 = vpop.f32.mrb[20].mxu1 }
 0xaae   :  { %v2638_v37 = vpop.f32.mrb[21].mxu1 }
 0xaaf   :  { %v836_v38 = vpop.f32.mrb[22].mxu1 }
 0xab0   :  { %v840_v39 = vpack.c.bf16 %v836_v38, %v833_v34  ;;  %v2639_v40 = vpop.f32.mrb[23].mxu1  ;;  %v1029_v34 = vld [vmem:[%s3689_s14 + $0x38] sm:$0xff]  ;;  %v2425_v38 = vld [vmem:[%s3688_s13] ss:$0 sm:$0xff] }
 0xab1   :  { %v1034_v37 = vpack.c.bf16 %v1029_v34, %v1028_v33 }
 0xab2   :  { %2643 = vmatmul.mubr.msk.bf16.vlgmr.msra.gmra.mrb[24].mxu0 %vm192_vm2, %v840_v39 }
 0xab3   :  { %2662 = vmatprep.mubr.msk.bf16.mxu0 %vm2963_vm1, %v2962_v17  ;;  %2655 = vmatpush3.bf16.msra.mxu0 %v1031_v30  ;;  %v1140_v30 = vpack.c.bf16 %v2434_v29, %v2433_v28 }
 0xab4   :  { %2656 = vmatprep.subr.bf16.mxu0 %v2962_v17 }
 0xab7   :  { %2657 = vmatpush3.bf16.msra.mxu0 %v1032_v45 }
 0xab8   :  { %2658 = vmatprep.subr.bf16.mxu0 %v2962_v17 }
 0xabb   :  { %2659 = vmatpush3.bf16.msra.mxu0 %v1033_v14 }
 0xabc   :  { %2660 = vmatprep.subr.bf16.mxu0 %v2962_v17 }
 0xabf   :  { %2661 = vmatpush3.bf16.msra.mxu0 %v1034_v37 }
 0xac0   :  { %2680 = vmatprep.subr.bf16.mxu0 %v2962_v17 }
 0xb85   :  { %v882_v41 = vpop.f32.mrb[24].mxu0 }
 0xb86   :  { %v889_v43 = vadd.f32 %v882_v41, %v713_v21  ;;  %v2644_v44 = vpop.f32.mrb[25].mxu0 }
 0xb87   :  { %v885_v46 = vpop.f32.mrb[26].mxu0 }
 0xb88   :  { %v898_v47 = vadd.f32 %v2422_v42, %v889_v43  ;;  %v890_v48 = vadd.f32 %v885_v46, %v714_v24  ;;  %v2645_v49 = vpop.f32.mrb[27].mxu0 }
 0xb8a   :  { %v899_v50 = vadd.f32 %v2422_v42, %v890_v48  ;;  %v900_v51 = vadd.f32 %v898_v47, %v3134_v35 }
 0xb8c   :  { %v904_v53 = vsel %vm82_vm0, %v900_v51, 0.0  ;;  %v901_v54 = vadd.f32 %v899_v50, %v3136_v36  ;;  %v946_v36 = vld [vmem:[%s3687_s12] sm:$0xff] }
 0xb8d   :  { %905 = vadd.xlane.f32.xlu1 %v904_v53  ;;  %v951_v3 = vpack.c.bf16 %v947_v2, %v946_v36  ;;  %v2427_v36 = vld [vmem:[%s3690_s15] ss:$0 sm:$0xff] }
 0xb8e   :  { %v907_v55 = vsel %vm82_vm0, %v901_v54, 0.0 }
 0xb8f   :  { %2647 = vmatpush3.bf16.msra.mxu1 %v951_v3 }
 0xb90   :  { %2648 = vmatprep.subr.bf16.mxu1 %v2962_v17 }
 0xb91   :  { %908 = vadd.xlane.f32.xlu1 %v907_v55 }
 0xb93   :  { %2649 = vmatpush3.bf16.msra.mxu1 %v952_v6 }
 0xb94   :  { %2666 = vmatprep.subr.bf16.mxu1 %v2962_v17 }
 0xc1a   :  { %v906_v57 = vpop.xlane.xlu1 %905 }
 0xc1b   :  { %v910_v58 = vmul.f32 0.03125, %v906_v57 }
 0xc1d   :  { %v912_v59 = vsub.f32 %v900_v51, %v910_v58 }
 0xc1e   :  { %v909_v60 = vpop.xlane.xlu1 %908 }
 0xc1f   :  { %v911_v61 = vmul.f32 0.03125, %v909_v60  ;;  %v914_v62 = vmul.f32 %v912_v59, %v912_v59 }
 0xc21   :  { %v913_v63 = vsub.f32 %v901_v54, %v911_v61  ;;  %v916_v0 = vsel %vm82_vm0, %v914_v62, 0.0 }
 0xc22   :  { %917 = vadd.xlane.f32.xlu1 %v916_v0 }
 0xc23   :  { %v915_v1 = vmul.f32 %v913_v63, %v913_v63 }
 0xc25   :  { %v919_v35 = vsel %vm82_vm0, %v915_v1, 0.0 }
 0xc26   :  { %920 = vadd.xlane.f32.xlu1 %v919_v35 }
 0xcaf   :  { %v918_v7 = vpop.xlane.xlu1 %917 }
 0xcb0   :  { %v922_v8 = vmul.f32 0.03125, %v918_v7 }
 0xcb2   :  { %v924_v9 = vadd.f32 1e-12, %v922_v8 }
 0xcb3   :  { %v921_v10 = vpop.xlane.xlu1 %920 }
 0xcb4   :  { %2846 = vrsqrt.f32 %v924_v9  ;;  %v923_v12 = vmul.f32 0.03125, %v921_v10 }
 0xcb6   :  { %v925_v13 = vadd.f32 1e-12, %v923_v12 }
 0xcb8   :  { %2848 = vrsqrt.f32 %v925_v13 }
 0xcbe   :  { %v2847_v15 = vpop.eup %2846 }
 0xcbf   :  { %v928_v16 = vmul.f32 %v2847_v15, %v912_v59 }
 0xcc1   :  { %v936_v20 = vmul.f32 %v2423_v18, %v928_v16 }
 0xcc2   :  { %v2849_v19 = vpop.eup %2848 }
 0xcc3   :  { %v929_v21 = vmul.f32 %v2849_v19, %v913_v63  ;;  %v3308_v24 = vadd.f32 %v2424_v22, %v936_v20 }
 0xcc5   :  { %v937_v23 = vmul.f32 %v2423_v18, %v929_v21 }
 0xcc7   :  { %v3310_v25 = vadd.f32 %v2424_v22, %v937_v23 }
 0xcc9   :  { %v950_v26 = vpack.c.bf16 %v3310_v25, %v3308_v24 }
 0xccb   :  { %2651 = vmatmul.mubr.msk.bf16.vlgmr.msra.gmra.mrb[24].mxu1 %vm82_vm0, %v950_v26  ;;  %v2432_v26 = vld [vmem:[%s3720_s2 + $0x28] sm:$0xff] }
 0xccc   :  { %2670 = vmatprep.mubr.msk.bf16.mxu1 %vm2963_vm1, %v2962_v17 }
 0xd9e   :  { %v997_v39 = vpop.f32.mrb[24].mxu1 }
 0xd9f   :  { %v998_v40 = vadd.f32 %v2425_v38, %v997_v39  ;;  %v2652_v41 = vpop.f32.mrb[25].mxu1 }
 0xda0   :  { %v1000_v42 = vpop.f32.mrb[26].mxu1 }
 0xda1   :  { %v1006_v43 = vmul.f32 0.044715, %v998_v40  ;;  %v1001_v44 = vadd.f32 %v2425_v38, %v1000_v42  ;;  %v2653_v46 = vpop.f32.mrb[27].mxu1  ;;  %v1004_v61 = vmul.f32 0.5, %v998_v40  ;;  %v2429_v38 = vld [vmem:[%s3691_s16] ss:$0 sm:$0xff] }
 0xda2   :  { %v2430_v42 = vld [vmem:[%s3692_s17] ss:$0 sm:$0xff] }
 0xda3   :  { %v1008_v47 = vmul.f32 %v1006_v43, %v998_v40  ;;  %v1007_v48 = vmul.f32 0.044715, %v1001_v44  ;;  %v1005_v62 = vmul.f32 0.5, %v1001_v44 }
 0xda5   :  { %v1010_v49 = vmul.f32 %v1008_v47, %v998_v40  ;;  %v1009_v50 = vmul.f32 %v1007_v48, %v1001_v44  ;;  %v2436_v48 = vld [vmem:[%s3723_s6 + $0x1] ss:$0 sm:$0xff]  ;;  %s3725_s6 = smov 56  }
 0xda7   :  { %v1012_v51 = vadd.f32 %v1010_v49, %v998_v40  ;;  %v1011_v53 = vmul.f32 %v1009_v50, %v1001_v44 }
 0xda9   :  { %v1014_v54 = vmul.f32 0.7978846, %v1012_v51  ;;  %v1013_v55 = vadd.f32 %v1011_v53, %v1001_v44 }
 0xdab   :  { %2850 = vtanh.f32 %v1014_v54  ;;  %v1015_v57 = vmul.f32 0.7978846, %v1013_v55 }
 0xdad   :  { %2852 = vtanh.f32 %v1015_v57 }
 0xdb5   :  { %v2851_v58 = vpop.eup %2850 }
 0xdb6   :  { %v1018_v59 = vadd.f32 1.0, %v2851_v58 }
 0xdb7   :  { %v2853_v60 = vpop.eup %2852 }
 0xdb8   :  { %v1019_v63 = vadd.f32 1.0, %v2853_v60  ;;  %v1020_v0 = vmul.f32 %v1018_v59, %v1004_v61 }
 0xdba   :  { %v1021_v1 = vmul.f32 %v1019_v63, %v1005_v62 }
 0xdbc   :  { %v1030_v35 = vpack.c.bf16 %v1021_v1, %v1020_v0 }
 0xdbe   :  { %2663 = vmatmul.mubr.msk.bf16.vlgmr.msra.gmra.mrb[28].mxu0 %vm1042_vm5, %v1030_v35 }
 0xdbf   :  { %2682 = vmatprep.mubr.msk.bf16.mxu0 %vm2963_vm1, %v2962_v17 }
 0xe91   :  { %v1080_v2 = vpop.f32.mrb[28].mxu0 }
 0xe92   :  { %v1081_v3 = vadd.f32 %v2427_v36, %v1080_v2  ;;  %v2664_v4 = vpop.f32.mrb[29].mxu0 }
 0xe93   :  { %v1083_v5 = vpop.f32.mrb[30].mxu0 }
 0xe94   :  { %v1084_v6 = vadd.f32 %v2427_v36, %v1083_v5  ;;  %v2665_v7 = vpop.f32.mrb[31].mxu0  ;;  %v1087_v8 = vadd.f32 %v1081_v3, %v3308_v24 }
 0xe96   :  { %v1091_v9 = vsel %vm82_vm0, %v1087_v8, 0.0  ;;  %v1088_v10 = vadd.f32 %v1084_v6, %v3310_v25  ;;  %v2431_v25 = vld [vmem:[%s3720_s2 + $0x20] sm:$0xff] }
 0xe97   :  { %1092 = vadd.xlane.f32.xlu1 %v1091_v9  ;;  %v1139_v27 = vpack.c.bf16 %v2432_v26, %v2431_v25 }
 0xe98   :  { %v1094_v12 = vsel %vm82_vm0, %v1088_v10, 0.0 }
 0xe99   :  { %2667 = vmatpush3.bf16.msra.mxu1 %v1139_v27 }
 0xe9a   :  { %2668 = vmatprep.subr.bf16.mxu1 %v2962_v17 }
 0xe9b   :  { %1095 = vadd.xlane.f32.xlu1 %v1094_v12 }
 0xe9d   :  { %2669 = vmatpush3.bf16.msra.mxu1 %v1140_v30 }
 0xe9e   :  { %2674 = vmatprep.subr.bf16.mxu1 %v2962_v17 }
 0xf24   :  { %v1093_v13 = vpop.xlane.xlu1 %1092 }
 0xf25   :  { %v1097_v15 = vmul.f32 0.03125, %v1093_v13 }
 0xf27   :  { %v1099_v16 = vsub.f32 %v1087_v8, %v1097_v15 }
 0xf28   :  { %v1096_v18 = vpop.xlane.xlu1 %1095 }
 0xf29   :  { %v1098_v19 = vmul.f32 0.03125, %v1096_v18  ;;  %v1101_v20 = vmul.f32 %v1099_v16, %v1099_v16 }
 0xf2b   :  { %v1100_v21 = vsub.f32 %v1088_v10, %v1098_v19  ;;  %v1103_v22 = vsel %vm82_vm0, %v1101_v20, 0.0 }
 0xf2c   :  { %1104 = vadd.xlane.f32.xlu0 %v1103_v22 }
 0xf2d   :  { %v1102_v23 = vmul.f32 %v1100_v21, %v1100_v21 }
 0xf2f   :  { %v1106_v24 = vsel %vm82_vm0, %v1102_v23, 0.0 }
 0xf30   :  { %1107 = vadd.xlane.f32.xlu1 %v1106_v24 }
 0xfb9   :  { %v1105_v31 = vpop.xlane.xlu0 %1104 }
 0xfba   :  { %v1109_v45 = vmul.f32 0.03125, %v1105_v31 }
 0xfbc   :  { %v1111_v32 = vadd.f32 1e-12, %v1109_v45 }
 0xfbd   :  { %v1108_v11 = vpop.xlane.xlu1 %1107 }
 0xfbe   :  { %2854 = vrsqrt.f32 %v1111_v32  ;;  %v1110_v14 = vmul.f32 0.03125, %v1108_v11 }
 0xfc0   :  { %v1112_v33 = vadd.f32 1e-12, %v1110_v14 }
 0xfc2   :  { %2856 = vrsqrt.f32 %v1112_v33 }
 0xfc8   :  { %v2855_v34 = vpop.eup %2854 }
 0xfc9   :  { %v1115_v37 = vmul.f32 %v2855_v34, %v1099_v16 }
 0xfcb   :  { %v1123_v40 = vmul.f32 %v2429_v38, %v1115_v37 }
 0xfcc   :  { %v2857_v39 = vpop.eup %2856 }
 0xfcd   :  { %v1116_v41 = vmul.f32 %v2857_v39, %v1100_v21  ;;  %v3380_v44 = vadd.f32 %v2430_v42, %v1123_v40 }
 0xfcf   :  { %v1124_v43 = vmul.f32 %v2429_v38, %v1116_v41 }
 0xfd1   :  { %v3382_v46 = vadd.f32 %v2430_v42, %v1124_v43 }
 0xfd3   :  { %v1138_v47 = vpack.c.bf16 %v3382_v46, %v3380_v44 }
 0xfd5   :  { %2671 = vmatmul.mubr.msk.bf16.vlgmr.msra.gmra.mrb[28].mxu1 %vm82_vm0, %v1138_v47 }
 0xfd6   :  { %2676 = vmatprep.mubr.msk.bf16.mxu1 %vm2963_vm1, %v2962_v17 }
0x10a8   :  { %v1186_v49 = vpop.f32.mrb[28].mxu1 }
0x10a9   :  { %v2672_v50 = vpop.f32.mrb[29].mxu1  ;;  %v1187_v53 = vadd.f32 %v2436_v48, %v1186_v49 }
0x10aa   :  { %v1189_v51 = vpop.f32.mrb[30].mxu1 }
0x10ab   :  { %v1190_v54 = vadd.f32 %v2436_v48, %v1189_v51  ;;  %v2673_v55 = vpop.f32.mrb[31].mxu1 }
0x10ad   :  { %v3392_v57 = vpack.c.bf16 %v1190_v54, %v1187_v53 }
0x10af   :  { %1200 = vrot.lane.b32.xlu1 %v3392_v57, %s2965_s7  ;;  %s3727_s7 = smov 64  }
0x10b3   :  { %1327 = vrot.lane.b32.xlu1 %v3392_v57, %s2964_s27  ;;  %s3726_s27 = smov 112  }
0x10b7   :  { %1325 = vrot.lane.b32.xlu1 %v3392_v57, %s2966_s28  ;;  %s3728_s28 = smov 80  }
0x1121   :  { %v1201_v58 = vpop.permute.xlu1 %1200 }
0x1122   :  { %v1206_v59 = vsel %vm192_vm2, %v1201_v58, 0 }
0x1123   :  { %2675 = vmatpush3.bf16.xpose.msra.mxu1 %v1206_v59  ;;  %v2438_v59 = vld [vmem:[%s3683_s8 + $0x20] sm:$0xff] }
0x1124   :  { %2686 = vmatprep.subr.bf16.mxu1 %v2962_v17 }
0x1125   :  { %v1328_v60 = vpop.permute.xlu1 %1327 }
0x1126   :  { %v1333_v61 = vsel %vm192_vm2, %v1328_v60, 0  ;;  %v1324_v60 = vpack.c.bf16 %v2438_v59, %v2438_v59 }
0x1129   :  { %v1326_v62 = vpop.permute.xlu1 %1325 }
0x112a   :  { %2677 = vmatmul.mubr.msk.bf16.vlgmr.msra.gmra.mrb[32].mxu1 %vm192_vm2, %v3392_v57 }
0x112b   :  { %2687 = vmatpush3.bf16.xpose.msra.mxu1 %v1333_v61  ;;  %2688 = vmatprep.mubr.msk.bf16.mxu1 %vm2963_vm1, %v2962_v17  ;;  %v2439_v61 = vld [vmem:[%s3683_s8 + $0x28] sm:$0xff] }
0x112c   :  { %2698 = vmatprep.subr.bf16.mxu1 %v2962_v17 }
0x1132   :  { %2689 = vmatmul.mubr.msk.bf16.vlgmr.msra.gmra.mrb[36].mxu1 %vm192_vm2, %v1326_v62  ;;  %v1503_v62 = vsel %vm447_vm4, %v1324_v60, 0 }
0x1133   :  { %2700 = vmatprep.mubr.msk.bf16.mxu1 %vm2963_vm1, %v2962_v17 }
0x11fd   :  { %v1242_v63 = vpop.f32.mrb[32].mxu1 }
0x11fe   :  { %v1249_v0 = vmul.f32 0.35355338, %v1242_v63  ;;  %v2678_v1 = vpop.f32.mrb[33].mxu1  ;;  %v1451_v63 = vpack.c.bf16 %v2439_v61, %v2439_v61  ;;  %v2440_v61 = vld [vmem:[%s3683_s8 + $0x30] sm:$0xff] }
0x11ff   :  { %v1245_v35 = vpop.f32.mrb[34].mxu1 }
0x1200   :  { %v1250_v36 = vmul.f32 0.35355338, %v1245_v35  ;;  %v2679_v2 = vpop.f32.mrb[35].mxu1  ;;  %v1251_v3 = vadd.f32 %v1249_v0, %v3168_v52  ;;  %v1456_v0 = vsel %vm447_vm4, %v1451_v63, 0 }
0x1201   :  { %2699 = vmatpush3.bf16.msra.mxu1 %v1456_v0 }
0x1202   :  { %v1253_v4 = vsel %vm244_vm3, %v1251_v3, -inf  ;;  %v1252_v5 = vadd.f32 %v1250_v36, %v3173_v56  ;;  %2710 = vmatprep.subr.bf16.mxu1 %v2962_v17 }
0x1203   :  { %1254 = vmax.xlane.f32.xlu0 %v1253_v4 }
0x1204   :  { %v1256_v6 = vsel %vm244_vm3, %v1252_v5, -inf }
0x1205   :  { %1257 = vmax.xlane.f32.xlu1 %v1256_v6  ;;  %v1369_v7 = vpop.f32.mrb[36].mxu1 }
0x1206   :  { %v1376_v8 = vmul.f32 0.35355338, %v1369_v7  ;;  %v2690_v9 = vpop.f32.mrb[37].mxu1 }
0x1207   :  { %v1372_v10 = vpop.f32.mrb[38].mxu1 }
0x1208   :  { %v1377_v12 = vmul.f32 0.35355338, %v1372_v10  ;;  %v2691_v13 = vpop.f32.mrb[39].mxu1  ;;  %v1378_v15 = vadd.f32 %v1376_v8, %v3168_v52 }
0x120a   :  { %v1380_v16 = vsel %vm244_vm3, %v1378_v15, -inf  ;;  %v1379_v18 = vadd.f32 %v1377_v12, %v3173_v56 }
0x120b   :  { %1381 = vmax.xlane.f32.xlu0 %v1380_v16 }
0x120c   :  { %v1383_v19 = vsel %vm244_vm3, %v1379_v18, -inf }
0x120f   :  { %1384 = vmax.xlane.f32.xlu0 %v1383_v19 }
0x1216   :  { %1403 = vrot.lane.b32.xlu1 %v3392_v57, %s3725_s6 }
0x121a   :  { %1546 = vrot.lane.b32.xlu1 %v3392_v57, %s3726_s27 }
0x1290   :  { %v1255_v20 = vpop.xlane.xlu0 %1254 }
0x1291   :  { %v1259_v21 = vsub.f32 %v1251_v3, %v1255_v20 }
0x1292   :  { %v1258_v22 = vpop.xlane.xlu1 %1257 }
0x1293   :  { %v1261_v23 = vmul.f32 1.442695, %v1259_v21  ;;  %v1260_v24 = vsub.f32 %v1252_v5, %v1258_v22 }
0x1295   :  { %2858 = vpow2.f32 %v1261_v23  ;;  %v1263_v52 = vmul.f32 1.442695, %v1260_v24 }
0x1296   :  { %v1404_v50 = vpop.permute.xlu1 %1403 }
0x1297   :  { %2860 = vpow2.f32 %v1263_v52 }
0x1298   :  { %v1382_v25 = vpop.xlane.xlu0 %1381 }
0x1299   :  { %v1386_v56 = vsub.f32 %v1378_v15, %v1382_v25 }
0x129a   :  { %v1547_v12 = vpop.permute.xlu1 %1546 }
0x129b   :  { %v1388_v26 = vmul.f32 1.442695, %v1386_v56 }
0x129c   :  { %v1385_v27 = vpop.xlane.xlu0 %1384 }
0x129d   :  { %2862 = vpow2.f32 %v1388_v26  ;;  %v1387_v28 = vsub.f32 %v1379_v18, %v1385_v27 }
0x129f   :  { %v2859_v29 = vpop.eup %2858  ;;  %v1390_v30 = vmul.f32 1.442695, %v1387_v28 }
0x12a0   :  { %v1265_v31 = vsel %vm244_vm3, %v2859_v29, 0.0 }
0x12a1   :  { %v2861_v45 = vpop.eup %2860  ;;  %2864 = vpow2.f32 %v1390_v30  ;;  %1266 = vadd.xlane.f32.xlu0 %v1265_v31 }
0x12a2   :  { %v1268_v32 = vsel %vm244_vm3, %v2861_v45, 0.0 }
0x12a5   :  { %1269 = vadd.xlane.f32.xlu0 %v1268_v32 }
0x12a7   :  { %v2863_v11 = vpop.eup %2862 }
0x12a8   :  { %v1392_v14 = vsel %vm244_vm3, %v2863_v11, 0.0 }
0x12a9   :  { %1393 = vadd.xlane.f32.xlu0 %v1392_v14 }
0x12ab   :  { %v2865_v33 = vpop.eup %2864 }
0x12ac   :  { %v1395_v34 = vsel %vm244_vm3, %v2865_v33, 0.0 }
0x12ad   :  { %1396 = vadd.xlane.f32.xlu0 %v1395_v34 }
0x12c3   :  { %1276 = vrot.lane.b32.xlu0 %v3392_v57, %s3727_s7  ;;  %s3732_s7 = smov 40  }
0x12c7   :  { %1548 = vrot.lane.b32.xlu0 %v3392_v57, %s3728_s28 }
0x132e   :  { %v1267_v37 = vpop.xlane.xlu0 %1266 }
0x132f   :  { %2866 = vrcp.f32 %v1267_v37 }
0x1332   :  { %v1270_v38 = vpop.xlane.xlu0 %1269 }
0x1333   :  { %2868 = vrcp.f32 %v1270_v38 }
0x1336   :  { %v1394_v39 = vpop.xlane.xlu0 %1393 }
0x1337   :  { %2870 = vrcp.f32 %v1394_v39 }
0x1339   :  { %v2867_v41 = vpop.eup %2866 }
0x133a   :  { %v1397_v40 = vpop.xlane.xlu0 %1396  ;;  %v1273_v43 = vmul.f32 %v2867_v41, %v2859_v29  ;;  %v3467_v29 = vld [vmem:[%s3724_s0] sm:$0xff] }
0x133b   :  { %2872 = vrcp.f32 %v1397_v40 }
0x133d   :  { %v2869_v42 = vpop.eup %2868 }
0x133e   :  { %v1274_v47 = vmul.f32 %v2869_v42, %v2861_v45  ;;  %v1277_v48 = vpop.permute.xlu0 %1276  ;;  %v3474_v45 = vld [vmem:[%s3724_s0 + $0x8] sm:$0xff]  ;;  %s3731_s0 = smov 48  }
0x133f   :  { %2681 = vmatpush3.bf16.msra.mxu0 %v1277_v48 }
0x1340   :  { %v1275_v49 = vpack.c.bf16 %v1274_v47, %v1273_v43  ;;  %2692 = vmatprep.subr.bf16.mxu0 %v2962_v17 }
0x1341   :  { %v2871_v51 = vpop.eup %2870 }
0x1342   :  { %2683 = vmatmul.mubr.msk.bf16.vlgmr.msra.gmra.mrb[32].mxu0 %vm244_vm3, %v1275_v49  ;;  %v1400_v54 = vmul.f32 %v2871_v51, %v2863_v11  ;;  %v1549_v6 = vpop.permute.xlu0 %1548 }
0x1343   :  { %2693 = vmatpush3.bf16.msra.mxu0 %v1404_v50  ;;  %2694 = vmatprep.mubr.msk.bf16.mxu0 %vm2963_vm1, %v2962_v17  ;;  %v1554_v10 = vsel %vm192_vm2, %v1549_v6, 0 }
0x1344   :  { %2704 = vmatprep.subr.bf16.mxu0 %v2962_v17 }
0x1345   :  { %v2873_v53 = vpop.eup %2872 }
0x1346   :  { %v1401_v55 = vmul.f32 %v2873_v53, %v2865_v33 }
0x1348   :  { %v1402_v58 = vpack.c.bf16 %v1401_v55, %v1400_v54 }
0x134a   :  { %2695 = vmatmul.mubr.msk.bf16.vlgmr.msra.gmra.mrb[36].mxu0 %vm244_vm3, %v1402_v58 }
0x134b   :  { %2706 = vmatprep.mubr.msk.bf16.mxu0 %vm2963_vm1, %v2962_v17  ;;  %2705 = vmatpush3.bf16.msra.mxu0 %v1503_v62  ;;  %v1672_v62 = vpack.c.bf16 %v2440_v61, %v2440_v61 }
0x134c   :  { %2716 = vmatprep.subr.bf16.mxu0 %v2962_v17 }
0x134d   :  { %v1677_v63 = vsel %vm447_vm4, %v1672_v62, 0 }
0x1415   :  { %v1316_v1 = vpop.f32.mrb[32].mxu0 }
0x1416   :  { %v2684_v35 = vpop.f32.mrb[33].mxu0 }
0x1417   :  { %v1319_v36 = vpop.f32.mrb[34].mxu0 }
0x1418   :  { %v1323_v2 = vpack.c.bf16 %v1319_v36, %v1316_v1  ;;  %v2685_v3 = vpop.f32.mrb[35].mxu0 }
0x141a   :  { %2707 = vmatmul.mubr.msk.bf16.vlgmr.msra.gmra.mrb[40].mxu0 %vm192_vm2, %v1323_v2 }
0x141b   :  { %2718 = vmatprep.mubr.msk.bf16.mxu0 %vm2963_vm1, %v2962_v17 }
0x141d   :  { %v1443_v4 = vpop.f32.mrb[36].mxu0 }
0x141e   :  { %v2696_v5 = vpop.f32.mrb[37].mxu0 }
0x141f   :  { %v1446_v7 = vpop.f32.mrb[38].mxu0 }
0x1420   :  { %v1450_v8 = vpack.c.bf16 %v1446_v7, %v1443_v4  ;;  %v2697_v9 = vpop.f32.mrb[39].mxu0 }
0x1422   :  { %2701 = vmatmul.mubr.msk.bf16.vlgmr.msra.gmra.mrb[40].mxu1 %vm192_vm2, %v1450_v8 }
0x1423   :  { %2711 = vmatpush3.bf16.xpose.msra.mxu1 %v1554_v10  ;;  %2712 = vmatprep.mubr.msk.bf16.mxu1 %vm2963_vm1, %v2962_v17 }
0x1424   :  { %2722 = vmatprep.subr.bf16.mxu1 %v2962_v17 }
0x142a   :  { %2713 = vmatmul.mubr.msk.bf16.vlgmr.msra.gmra.mrb[44].mxu1 %vm192_vm2, %v1547_v12 }
0x142b   :  { %2724 = vmatprep.mubr.msk.bf16.mxu1 %vm2963_vm1, %v2962_v17  ;;  %2723 = vmatpush3.bf16.msra.mxu1 %v1677_v63 }
0x142c   :  { %2734 = vmatprep.subr.bf16.mxu1 %v2962_v17 }
0x14ed   :  { %v1539_v13 = vpop.f32.mrb[40].mxu0 }
0x14ee   :  { %v2708_v15 = vpop.f32.mrb[41].mxu0 }
0x14ef   :  { %v1542_v16 = vpop.f32.mrb[42].mxu0 }
0x14f0   :  { %v2709_v18 = vpop.f32.mrb[43].mxu0 }
0x14f5   :  { %v1492_v19 = vpop.f32.mrb[40].mxu1 }
0x14f6   :  { %v3460_v20 = vadd.f32 %v1539_v13, %v1492_v19  ;;  %v2702_v21 = vpop.f32.mrb[41].mxu1 }
0x14f7   :  { %v1495_v22 = vpop.f32.mrb[42].mxu1 }
0x14f8   :  { %v3462_v23 = vadd.f32 %v1542_v16, %v1495_v22  ;;  %v2703_v24 = vpop.f32.mrb[43].mxu1 }
0x14fd   :  { %v1590_v52 = vpop.f32.mrb[44].mxu1 }
0x14fe   :  { %v1597_v25 = vmul.f32 0.35355338, %v1590_v52  ;;  %v2714_v56 = vpop.f32.mrb[45].mxu1 }
0x14ff   :  { %v1593_v26 = vpop.f32.mrb[46].mxu1 }
0x1500   :  { %v1598_v27 = vmul.f32 0.35355338, %v1593_v26  ;;  %v2715_v28 = vpop.f32.mrb[47].mxu1  ;;  %v1599_v30 = vadd.f32 %v3467_v29, %v1597_v25 }
0x1502   :  { %v1601_v31 = vsel %vm244_vm3, %v1599_v30, -inf  ;;  %v1600_v32 = vadd.f32 %v3474_v45, %v1598_v27 }
0x1503   :  { %1602 = vmax.xlane.f32.xlu0 %v1601_v31 }
0x1504   :  { %v1604_v11 = vsel %vm244_vm3, %v1600_v32, -inf }
0x1505   :  { %1605 = vmax.xlane.f32.xlu1 %v1604_v11 }
0x1516   :  { %1724 = vrot.lane.b32.xlu1 %v3392_v57, %s3729_s25 }
0x151a   :  { %1722 = vrot.lane.b32.xlu1 %v3392_v57, %s3730_s26 }
0x1590   :  { %v1603_v14 = vpop.xlane.xlu0 %1602 }
0x1591   :  { %v1607_v33 = vsub.f32 %v1599_v30, %v1603_v14 }
0x1592   :  { %v1606_v34 = vpop.xlane.xlu1 %1605 }
0x1593   :  { %v1609_v37 = vmul.f32 1.442695, %v1607_v33  ;;  %v1608_v38 = vsub.f32 %v1600_v32, %v1606_v34 }
0x1595   :  { %2874 = vpow2.f32 %v1609_v37  ;;  %v1611_v39 = vmul.f32 1.442695, %v1608_v38 }
0x1596   :  { %v1725_v55 = vpop.permute.xlu1 %1724 }
0x1597   :  { %2876 = vpow2.f32 %v1611_v39  ;;  %v1730_v59 = vsel %vm192_vm2, %v1725_v55, 0 }
0x159a   :  { %v1723_v60 = vpop.permute.xlu1 %1722 }
0x159f   :  { %v2875_v40 = vpop.eup %2874 }
0x15a0   :  { %v1613_v41 = vsel %vm244_vm3, %v2875_v40, 0.0 }
0x15a1   :  { %v2877_v42 = vpop.eup %2876  ;;  %1614 = vadd.xlane.f32.xlu0 %v1613_v41 }
0x15a2   :  { %v1616_v43 = vsel %vm244_vm3, %v2877_v42, 0.0 }
0x15a5   :  { %1617 = vadd.xlane.f32.xlu0 %v1616_v43 }
0x15bb   :  { %1624 = vrot.lane.b32.xlu0 %v3392_v57, %s3731_s0 }
0x162e   :  { %v1615_v47 = vpop.xlane.xlu0 %1614 }
0x162f   :  { %2878 = vrcp.f32 %v1615_v47 }
0x1632   :  { %v1618_v48 = vpop.xlane.xlu0 %1617 }
0x1633   :  { %2880 = vrcp.f32 %v1618_v48  ;;  %v2455_v48 = vld [vmem:[%s3684_s9 + $0x1] ss:$0 sm:$0xff] }
0x1636   :  { %v1625_v49 = vpop.permute.xlu0 %1624 }
0x1637   :  { %2717 = vmatpush3.bf16.msra.mxu0 %v1625_v49 }
0x1638   :  { %2728 = vmatprep.subr.bf16.mxu0 %v2962_v17 }
0x1639   :  { %v2879_v50 = vpop.eup %2878 }
0x163a   :  { %v1621_v53 = vmul.f32 %v2879_v50, %v2875_v40 }
0x163d   :  { %v2881_v51 = vpop.eup %2880 }
0x163e   :  { %v1622_v54 = vmul.f32 %v2881_v51, %v2877_v42 }
0x1640   :  { %v1623_v58 = vpack.c.bf16 %v1622_v54, %v1621_v53 }
0x1642   :  { %2719 = vmatmul.mubr.msk.bf16.vlgmr.msra.gmra.mrb[44].mxu0 %vm244_vm3, %v1623_v58 }
0x1643   :  { %2729 = vmatpush3.bf16.xpose.msra.mxu0 %v1730_v59  ;;  %2730 = vmatprep.mubr.msk.bf16.mxu0 %vm2963_vm1, %v2962_v17 }
0x1644   :  { %2740 = vmatprep.subr.bf16.mxu0 %v2962_v17 }
0x164a   :  { %2731 = vmatmul.mubr.msk.bf16.vlgmr.msra.gmra.mrb[48].mxu0 %vm192_vm2, %v1723_v60 }
0x164b   :  { %2742 = vmatprep.mubr.msk.bf16.mxu0 %vm2963_vm1, %v2962_v17 }
0x1715   :  { %v1664_v0 = vpop.f32.mrb[44].mxu0 }
0x1716   :  { %v2720_v1 = vpop.f32.mrb[45].mxu0 }
0x1717   :  { %v1667_v35 = vpop.f32.mrb[46].mxu0 }
0x1718   :  { %v1671_v36 = vpack.c.bf16 %v1667_v35, %v1664_v0  ;;  %v2721_v2 = vpop.f32.mrb[47].mxu0 }
0x171a   :  { %2725 = vmatmul.mubr.msk.bf16.vlgmr.msra.gmra.mrb[48].mxu1 %vm192_vm2, %v1671_v36 }
0x171b   :  { %2736 = vmatprep.mubr.msk.bf16.mxu1 %vm2963_vm1, %v2962_v17 }
0x171d   :  { %v1766_v3 = vpop.f32.mrb[48].mxu0 }
0x171e   :  { %v1773_v4 = vmul.f32 0.35355338, %v1766_v3  ;;  %v2732_v5 = vpop.f32.mrb[49].mxu0 }
0x171f   :  { %v1769_v6 = vpop.f32.mrb[50].mxu0 }
0x1720   :  { %v1774_v7 = vmul.f32 0.35355338, %v1769_v6  ;;  %v2733_v8 = vpop.f32.mrb[51].mxu0  ;;  %v1775_v9 = vadd.f32 %v3467_v29, %v1773_v4  ;;  %v2461_v6 = vld [vmem:[%s3687_s12 + $0x28] sm:$0xff] }
0x1721   :  { %v2462_v8 = vld [vmem:[%s3687_s12 + $0x30] sm:$0xff] }
0x1722   :  { %v1777_v10 = vsel %vm244_vm3, %v1775_v9, -inf  ;;  %v1776_v12 = vadd.f32 %v3474_v45, %v1774_v7 }
0x1723   :  { %1778 = vmax.xlane.f32.xlu1 %v1777_v10 }
0x1724   :  { %v1780_v13 = vsel %vm244_vm3, %v1776_v12, -inf }
0x1725   :  { %1781 = vmax.xlane.f32.xlu0 %v1780_v13 }
0x1734   :  { %1800 = vrot.lane.b32.xlu1 %v3392_v57, %s3732_s7 }
0x17b0   :  { %v1779_v15 = vpop.xlane.xlu1 %1778 }
0x17b1   :  { %v1783_v16 = vsub.f32 %v1775_v9, %v1779_v15  ;;  %v2463_v9 = vld [vmem:[%s3687_s12 + $0x38] sm:$0xff] }
0x17b2   :  { %v1782_v18 = vpop.xlane.xlu0 %1781  ;;  %v1963_v10 = vpack.c.bf16 %v2463_v9, %v2462_v8 }
0x17b3   :  { %v1785_v19 = vmul.f32 1.442695, %v1783_v16  ;;  %v1784_v21 = vsub.f32 %v1776_v12, %v1782_v18 }
0x17b4   :  { %v1801_v22 = vpop.permute.xlu1 %1800 }
0x17b5   :  { %2882 = vpow2.f32 %v1785_v19  ;;  %v1787_v24 = vmul.f32 1.442695, %v1784_v21  ;;  %2735 = vmatpush3.bf16.msra.mxu1 %v1801_v22 }
0x17b6   :  { %2746 = vmatprep.subr.bf16.mxu1 %v2962_v17 }
0x17b7   :  { %2884 = vpow2.f32 %v1787_v24  ;;  %v2458_v24 = vld [vmem:[%s3685_s10 + $0x1] ss:$0 sm:$0xff] }
0x17bf   :  { %v2883_v52 = vpop.eup %2882 }
0x17c0   :  { %v1789_v25 = vsel %vm244_vm3, %v2883_v52, 0.0 }
0x17c1   :  { %v2885_v56 = vpop.eup %2884  ;;  %1790 = vadd.xlane.f32.xlu0 %v1789_v25 }
0x17c2   :  { %v1792_v26 = vsel %vm244_vm3, %v2885_v56, 0.0 }
0x17c5   :  { %1793 = vadd.xlane.f32.xlu0 %v1792_v26  ;;  %v2459_v26 = vld [vmem:[%s3686_s11 + $0x1] ss:$0 sm:$0xff] }
0x17ed   :  { %v1713_v57 = vpop.f32.mrb[48].mxu1 }
0x17ee   :  { %v1720_v27 = vadd.f32 %v1713_v57, %v3460_v20  ;;  %v2726_v28 = vpop.f32.mrb[49].mxu1  ;;  %v2441_v20 = vld [vmem:[%s3683_s8 + $0x38] sm:$0xff] }
0x17ef   :  { %v1716_v29 = vpop.f32.mrb[50].mxu1 }
0x17f0   :  { %v1721_v30 = vadd.f32 %v1716_v29, %v3462_v23  ;;  %v2727_v31 = vpop.f32.mrb[51].mxu1  ;;  %v1848_v23 = vpack.c.bf16 %v2441_v20, %v2441_v20  ;;  %v2473_v20 = vld [vmem:[%s3689_s14 + $0x70] sm:$0xff] }
0x17f1   :  { %v2468_v31 = vld [vmem:[%s3689_s14 + $0x48] sm:$0xff] }
0x17f2   :  { %v1853_v38 = vsel %vm447_vm4, %v1848_v23, 0  ;;  %v2474_v23 = vld [vmem:[%s3689_s14 + $0x78] sm:$0xff] }
0x17f3   :  { %2741 = vmatpush3.bf16.msra.mxu0 %v1853_v38  ;;  %v2047_v38 = vpack.c.bf16 %v2474_v23, %v2473_v20  ;;  %v2481_v20 = vld [vmem:[%s3692_s17 + $0x1] ss:$0 sm:$0xff] }
0x17f4   :  { %2754 = vmatprep.subr.bf16.mxu0 %v2962_v17 }
0x184e   :  { %v1791_v45 = vpop.xlane.xlu0 %1790 }
0x184f   :  { %2886 = vrcp.f32 %v1791_v45  ;;  %v2469_v45 = vld [vmem:[%s3689_s14 + $0x50] sm:$0xff] }
0x1852   :  { %v1794_v32 = vpop.xlane.xlu0 %1793 }
0x1853   :  { %2888 = vrcp.f32 %v1794_v32 }
0x1859   :  { %v2887_v11 = vpop.eup %2886 }
0x185a   :  { %v1797_v33 = vmul.f32 %v2887_v11, %v2883_v52  ;;  %v2470_v11 = vld [vmem:[%s3689_s14 + $0x58] sm:$0xff] }
0x185d   :  { %v2889_v14 = vpop.eup %2888 }
0x185e   :  { %v1798_v34 = vmul.f32 %v2889_v14, %v2885_v56  ;;  %v2045_v14 = vpack.c.bf16 %v2470_v11, %v2469_v45 }
0x1860   :  { %v1799_v37 = vpack.c.bf16 %v1798_v34, %v1797_v33  ;;  %v2471_v33 = vld [vmem:[%s3689_s14 + $0x60] sm:$0xff]  ;;  %v2472_v34 = vld [vmem:[%s3689_s14 + $0x68] sm:$0xff] }
0x1862   :  { %2737 = vmatmul.mubr.msk.bf16.vlgmr.msra.gmra.mrb[52].mxu1 %vm244_vm3, %v1799_v37  ;;  %v2046_v37 = vpack.c.bf16 %v2472_v34, %v2471_v33 }
0x1863   :  { %2750 = vmatprep.mubr.msk.bf16.mxu1 %vm2963_vm1, %v2962_v17 }
0x1935   :  { %v1840_v39 = vpop.f32.mrb[52].mxu1 }
0x1936   :  { %v2738_v40 = vpop.f32.mrb[53].mxu1 }
0x1937   :  { %v1843_v41 = vpop.f32.mrb[54].mxu1 }
0x1938   :  { %v1847_v42 = vpack.c.bf16 %v1843_v41, %v1840_v39  ;;  %v2739_v43 = vpop.f32.mrb[55].mxu1  ;;  %v2465_v39 = vld [vmem:[%s3688_s13 + $0x1] ss:$0 sm:$0xff] }
0x193a   :  { %2743 = vmatmul.mubr.msk.bf16.vlgmr.msra.gmra.mrb[52].mxu0 %vm192_vm2, %v1847_v42 }
0x193b   :  { %2762 = vmatprep.mubr.msk.bf16.mxu0 %vm2963_vm1, %v2962_v17 }
0x1a0d   :  { %v1889_v47 = vpop.f32.mrb[52].mxu0 }
0x1a0e   :  { %v1896_v49 = vadd.f32 %v1889_v47, %v1720_v27  ;;  %v2744_v50 = vpop.f32.mrb[53].mxu0 }
0x1a0f   :  { %v1892_v51 = vpop.f32.mrb[54].mxu0 }
0x1a10   :  { %v1906_v53 = vadd.f32 %v2455_v48, %v1896_v49  ;;  %v1897_v54 = vadd.f32 %v1892_v51, %v1721_v30  ;;  %v2745_v55 = vpop.f32.mrb[55].mxu0  ;;  %v2467_v30 = vld [vmem:[%s3689_s14 + $0x40] sm:$0xff] }
0x1a11   :  { %v2044_v32 = vpack.c.bf16 %v2468_v31, %v2467_v30 }
0x1a12   :  { %v1907_v58 = vadd.f32 %v2455_v48, %v1897_v54  ;;  %v1908_v59 = vadd.f32 %v1906_v53, %v3380_v44 }
0x1a13   :  { %2755 = vmatpush3.bf16.msra.mxu0 %v2044_v32 }
0x1a14   :  { %v1914_v60 = vsel %vm82_vm0, %v1908_v59, 0.0  ;;  %v1909_v61 = vadd.f32 %v1907_v58, %v3382_v46  ;;  %v2460_v46 = vld [vmem:[%s3687_s12 + $0x20] sm:$0xff]  ;;  %2756 = vmatprep.subr.bf16.mxu0 %v2962_v17  ;;  %s2976_s12 = smov [#allocation2]  }
0x1a15   :  { %1915 = vadd.xlane.f32.xlu0 %v1914_v60  ;;  %v1962_v7 = vpack.c.bf16 %v2461_v6, %v2460_v46  ;;  %s2384_s6 = sshll.u32 %s2976_s12, 4  ;;  %s2385_s6 = int_to_ptr.vmem [resolvable:$true] %s2384_s6 }
0x1a16   :  { %v1917_v62 = vsel %vm82_vm0, %v1909_v61, 0.0  ;;  %s2914_s27 = scalar_lea.vmem %s2385_s6, 32  ;;  %p2919_p1 = scmp.lt.s32.totalorder %s2385_s6, %s2385_s6 }
0x1a17   :  { %2747 = vmatpush3.bf16.msra.mxu1 %v1962_v7  ;;  %2757 = vmatpush3.bf16.msra.mxu0 %v2045_v14  ;;  %v2480_v14 = vld [vmem:[%s3691_s16 + $0x1] ss:$0 sm:$0xff]  ;;  %p2915_p0 = scmp.ne.s32.totalorder %s2385_s6, %s2914_s27  ;;  %p2920_p2 = scmp.lt.s32.totalorder %s2914_s27, %s2914_s27 }
0x1a18   :  { %2748 = vmatprep.subr.bf16.mxu1 %v2962_v17  ;;  %2758 = vmatprep.subr.bf16.mxu0 %v2962_v17 }
0x1a19   :  { %1918 = vadd.xlane.f32.xlu0 %v1917_v62  ;;  %p2921_p3 = por %p2920_p2, %p2919_p1 }
0x1a1b   :  { %2749 = vmatpush3.bf16.msra.mxu1 %v1963_v10  ;;  %2759 = vmatpush3.bf16.msra.mxu0 %v2046_v37  ;;  %p2922_p4 = pnand %p2921_p3, %p2915_p0 }
0x1a1c   :  { %2760 = vmatprep.subr.bf16.mxu0 %v2962_v17 }
0x1a1f   :  { %2761 = vmatpush3.bf16.msra.mxu0 %v2047_v38 }
0x1a20   :  { %2781 = vmatprep.subr.bf16.mxu0 %v2962_v17 }
0x1aa2   :  { %v1916_v63 = vpop.xlane.xlu0 %1915 }
0x1aa3   :  { %v1920_v0 = vmul.f32 0.03125, %v1916_v63 }
0x1aa5   :  { %v1922_v1 = vsub.f32 %v1908_v59, %v1920_v0 }
0x1aa6   :  { %v1919_v35 = vpop.xlane.xlu0 %1918 }
0x1aa7   :  { %v1921_v36 = vmul.f32 0.03125, %v1919_v35  ;;  %v1924_v2 = vmul.f32 %v1922_v1, %v1922_v1 }
0x1aa9   :  { %v1923_v3 = vsub.f32 %v1909_v61, %v1921_v36  ;;  %v1926_v4 = vsel %vm82_vm0, %v1924_v2, 0.0 }
0x1aaa   :  { %1927 = vadd.xlane.f32.xlu0 %v1926_v4 }
0x1aab   :  { %v1925_v5 = vmul.f32 %v1923_v3, %v1923_v3 }
0x1aad   :  { %v1929_v44 = vsel %vm82_vm0, %v1925_v5, 0.0  ;;  %v2476_v5 = vld [vmem:[%s3690_s15 + $0x1] ss:$0 sm:$0xff] }
0x1aae   :  { %1930 = vadd.xlane.f32.xlu0 %v1929_v44 }
0x1b37   :  { %v1928_v12 = vpop.xlane.xlu0 %1927 }
0x1b38   :  { %v1932_v13 = vmul.f32 0.03125, %v1928_v12 }
0x1b3a   :  { %v1934_v15 = vadd.f32 1e-12, %v1932_v13 }
0x1b3b   :  { %v1931_v16 = vpop.xlane.xlu0 %1930 }
0x1b3c   :  { %2890 = vrsqrt.f32 %v1934_v15  ;;  %v1933_v18 = vmul.f32 0.03125, %v1931_v16 }
0x1b3e   :  { %v1935_v19 = vadd.f32 1e-12, %v1933_v18 }
0x1b40   :  { %2892 = vrsqrt.f32 %v1935_v19 }
0x1b46   :  { %v2891_v21 = vpop.eup %2890 }
0x1b47   :  { %v1938_v22 = vmul.f32 %v2891_v21, %v1922_v1 }
0x1b49   :  { %v1946_v25 = vmul.f32 %v2458_v24, %v1938_v22 }
0x1b4a   :  { %v2893_v52 = vpop.eup %2892 }
0x1b4b   :  { %v1939_v56 = vmul.f32 %v2893_v52, %v1923_v3  ;;  %v1954_v27 = vadd.f32 %v2459_v26, %v1946_v25 }
0x1b4d   :  { %v1947_v57 = vmul.f32 %v2458_v24, %v1939_v56 }
0x1b4f   :  { %v3553_v28 = vadd.f32 %v2459_v26, %v1947_v57  ;;  %v2975_v57 = vmov 0.0|0.0  }
0x1b50   :  { %2789 = vmatprep.subr.bf16.mxu1 %v2975_v57 }
0x1b51   :  { %v1961_v29 = vpack.c.bf16 %v3553_v28, %v1954_v27 }
0x1b53   :  { %2751 = vmatmul.mubr.msk.bf16.vlgmr.msra.gmra.mrb[56].mxu1 %vm82_vm0, %v1961_v29 }
0x1b54   :  { %2770 = vmatprep.mubr.msk.f32.mxu1 %vm2963_vm1, %v2962_v17 }
0x1c26   :  { %v2009_v40 = vpop.f32.mrb[56].mxu1 }
0x1c27   :  { %v2010_v41 = vadd.f32 %v2465_v39, %v2009_v40  ;;  %v2752_v42 = vpop.f32.mrb[57].mxu1  ;;  %v2222_v40 = vld [vmem:[%s3693_s18] sm:$0xff] }
0x1c28   :  { %v2012_v43 = vpop.f32.mrb[58].mxu1 }
0x1c29   :  { %v2018_v47 = vmul.f32 0.044715, %v2010_v41  ;;  %v2013_v48 = vadd.f32 %v2465_v39, %v2012_v43  ;;  %v2753_v49 = vpop.f32.mrb[59].mxu1  ;;  %v2016_v1 = vmul.f32 0.5, %v2010_v41  ;;  %v2148_v43 = vld [vmem:[%s3733_s1] sm:$0x3] }
0x1c2a   :  { %v2225_v49 = vld [vmem:[%s3693_s18 + $0x18] sm:$0xff] }
0x1c2b   :  { %v2020_v50 = vmul.f32 %v2018_v47, %v2010_v41  ;;  %v2019_v51 = vmul.f32 0.044715, %v2013_v48  ;;  %v2017_v35 = vmul.f32 0.5, %v2013_v48 }
0x1c2d   :  { %v2022_v53 = vmul.f32 %v2020_v50, %v2010_v41  ;;  %v2021_v54 = vmul.f32 %v2019_v51, %v2013_v48 }
0x1c2f   :  { %v2024_v55 = vadd.f32 %v2022_v53, %v2010_v41  ;;  %v2023_v58 = vmul.f32 %v2021_v54, %v2013_v48  ;;  %v2223_v41 = vld [vmem:[%s3693_s18 + $0x8] sm:$0xff] }
0x1c30   :  { %v2227_v47 = vpack.c.bf16 %v2223_v41, %v2222_v40 }
0x1c31   :  { %v2026_v59 = vmul.f32 0.7978846, %v2024_v55  ;;  %v2025_v60 = vadd.f32 %v2023_v58, %v2013_v48  ;;  %v2224_v48 = vld [vmem:[%s3693_s18 + $0x10] sm:$0xff]  ;;  %v2280_v55 = vld [vmem:[%s3695_s20] sm:$0xff]  ;;  %v2281_v58 = vld [vmem:[%s3695_s20 + $0x8] sm:$0xff] }
0x1c32   :  { %v2228_v50 = vpack.c.bf16 %v2225_v49, %v2224_v48 }
0x1c33   :  { %2894 = vtanh.f32 %v2026_v59  ;;  %v2027_v61 = vmul.f32 0.7978846, %v2025_v60  ;;  %v2285_v59 = vpack.c.bf16 %v2281_v58, %v2280_v55  ;;  %v2282_v60 = vld [vmem:[%s3695_s20 + $0x10] sm:$0xff] }
0x1c35   :  { %2896 = vtanh.f32 %v2027_v61  ;;  %v2283_v61 = vld [vmem:[%s3695_s20 + $0x18] sm:$0xff] }
0x1c3d   :  { %v2895_v62 = vpop.eup %2894 }
0x1c3e   :  { %v2030_v63 = vadd.f32 1.0, %v2895_v62  ;;  %v2286_v62 = vpack.c.bf16 %v2283_v61, %v2282_v60 }
0x1c3f   :  { %v2897_v0 = vpop.eup %2896 }
0x1c40   :  { %v2031_v36 = vadd.f32 1.0, %v2897_v0  ;;  %v2032_v2 = vmul.f32 %v2030_v63, %v2016_v1  ;;  %v2483_v63 = vld [vmem:[%s3694_s19] ss:$0 sm:$0xff] }
0x1c42   :  { %v2033_v3 = vmul.f32 %v2031_v36, %v2017_v35 }
0x1c44   :  { %v2043_v4 = vpack.c.bf16 %v2033_v3, %v2032_v2 }
0x1c46   :  { %2763 = vmatmul.mubr.msk.bf16.vlgmr.msra.gmra.mrb[56].mxu0 %vm1042_vm5, %v2043_v4  ;;  %v2485_v4 = vld [vmem:[%s3696_s21] ss:$0 sm:$0xff]  ;;  %s3734_s21 = sld [smem:[#allocation11_spill]] }
0x1c47   :  { %2785 = vmatprep.mubr.msk.bf16.mxu0 %vm2963_vm1, %v2962_v17  ;;  %2782 = vmatpush3.bf16.msra.mxu0 %v2285_v59 }
0x1c48   :  { %2783 = vmatprep.subr.bf16.mxu0 %v2962_v17 }
0x1c4b   :  { %2784 = vmatpush3.bf16.msra.mxu0 %v2286_v62 }
0x1d19   :  { %v2093_v44 = vpop.f32.mrb[56].mxu0 }
0x1d1a   :  { %v2094_v46 = vadd.f32 %v2476_v5, %v2093_v44  ;;  %v2764_v6 = vpop.f32.mrb[57].mxu0 }
0x1d1b   :  { %v2096_v7 = vpop.f32.mrb[58].mxu0 }
0x1d1c   :  { %v2097_v8 = vadd.f32 %v2476_v5, %v2096_v7  ;;  %v2765_v9 = vpop.f32.mrb[59].mxu0  ;;  %v2100_v10 = vadd.f32 %v2094_v46, %v1954_v27 }
0x1d1e   :  { %v2106_v12 = vsel %vm82_vm0, %v2100_v10, 0.0  ;;  %v2101_v13 = vadd.f32 %v2097_v8, %v3553_v28 }
0x1d1f   :  { %2107 = vadd.xlane.f32.xlu1 %v2106_v12 }
0x1d20   :  { %v2109_v15 = vsel %vm82_vm0, %v2101_v13, 0.0 }
0x1d21   :  { %2110 = vadd.xlane.f32.xlu0 %v2109_v15 }
0x1dac   :  { %v2108_v16 = vpop.xlane.xlu1 %2107 }
0x1dad   :  { %v2112_v18 = vmul.f32 0.03125, %v2108_v16 }
0x1dae   :  { %v2111_v19 = vpop.xlane.xlu0 %2110 }
0x1daf   :  { %v2114_v21 = vsub.f32 %v2100_v10, %v2112_v18  ;;  %v2113_v22 = vmul.f32 0.03125, %v2111_v19  ;;  %v2344_v18 = vld [vmem:[%s3734_s21] sm:$0x3] }
0x1db1   :  { %v2115_v24 = vsub.f32 %v2101_v13, %v2113_v22  ;;  %v2116_v52 = vmul.f32 %v2114_v21, %v2114_v21  ;;  %v2345_v22 = vlaneseq }
0x1db3   :  { %v2118_v25 = vsel %vm82_vm0, %v2116_v52, 0.0  ;;  %v2117_v56 = vmul.f32 %v2115_v24, %v2115_v24 }
0x1db4   :  { %2119 = vadd.xlane.f32.xlu0 %v2118_v25  ;;  %v2356_v25 = vsub.f32 1.0, %v2344_v18 }
0x1db5   :  { %v2121_v26 = vsel %vm82_vm0, %v2117_v56, 0.0 }
0x1db8   :  { %2122 = vadd.xlane.f32.xlu0 %v2121_v26  ;;  %v2346_v26 = vand.u32 127, %v2345_v22 }
0x1dba   :  { %vm2347_vm6 = vcmp.lt.s32.totalorder %v2346_v26, 6 }
0x1e41   :  { %v2120_v27 = vpop.xlane.xlu0 %2119 }
0x1e42   :  { %v2124_v28 = vmul.f32 0.03125, %v2120_v27 }
0x1e44   :  { %v2126_v29 = vadd.f32 1e-12, %v2124_v28 }
0x1e45   :  { %v2123_v30 = vpop.xlane.xlu0 %2122 }
0x1e46   :  { %2898 = vrsqrt.f32 %v2126_v29  ;;  %v2125_v31 = vmul.f32 0.03125, %v2123_v30 }
0x1e48   :  { %v2127_v45 = vadd.f32 1e-12, %v2125_v31 }
0x1e4a   :  { %2900 = vrsqrt.f32 %v2127_v45 }
0x1e50   :  { %v2899_v32 = vpop.eup %2898 }
0x1e51   :  { %v2130_v11 = vmul.f32 %v2899_v32, %v2114_v21 }
0x1e53   :  { %v2138_v37 = vmul.f32 %v2480_v14, %v2130_v11 }
0x1e54   :  { %v2901_v33 = vpop.eup %2900 }
0x1e55   :  { %v2131_v34 = vmul.f32 %v2901_v33, %v2115_v24  ;;  %v2146_v38 = vadd.f32 %v2481_v20, %v2138_v37 }
0x1e57   :  { %v2139_v23 = vmul.f32 %v2480_v14, %v2131_v34 }
0x1e59   :  { %v2147_v39 = vadd.f32 %v2481_v20, %v2139_v23 }
0x1e5b   :  { %v2790_v42 = vpack.c.bf16 %v2147_v39, %v2146_v38 }
0x1e5d   :  { %2791 = vmatpush3.bf16.msra.mxu1 %v2790_v42 }
0x1e5e   :  { %2773 = vmatprep.subr.bf16.mxu1 %v2962_v17 }
0x1e60   :  { %2771 = vmatmul.mubr.msk.f32.vlgmr.msra.gmra.mrb[60].mxu1 %vm244_vm3, %v2148_v43 }
0x1e61   :  { %2774 = vmatpush3.bf16.msra.mxu1 %v2227_v47  ;;  %2777 = vmatprep.mubr.msk.bf16.mxu1 %vm2963_vm1, %v2962_v17 }
0x1e62   :  { %2775 = vmatprep.subr.bf16.mxu1 %v2962_v17 }
0x1e65   :  { %2776 = vmatpush3.bf16.msra.mxu1 %v2228_v50 }
0x1f33   :  { %v2218_v51 = vpop.f32.mrb[60].mxu1 }
0x1f34   :  { %v2226_v53 = vpack.c.bf16 %v2218_v51, %v2218_v51  ;;  %v2772_v54 = vpop.f32.mrb[61].mxu1 }
0x1f36   :  { %2778 = vmatmul.mubr.msk.bf16.vlgmr.msra.gmra.mrb[64].mxu1 %vm82_vm0, %v2226_v53 }
0x2009   :  { %v2273_v0 = vpop.f32.mrb[64].mxu1 }
0x200a   :  { %v2274_v1 = vadd.f32 %v2483_v63, %v2273_v0  ;;  %v2779_v35 = vpop.f32.mrb[65].mxu1 }
0x200b   :  { %v2276_v36 = vpop.f32.mrb[66].mxu1 }
0x200c   :  { %2902 = vtanh.f32 %v2274_v1  ;;  %v2780_v17 = vpop.f32.mrb[67].mxu1 }
0x2016   :  { %v2903_v2 = vpop.eup %2902 }
0x2017   :  { %v2284_v3 = vpack.c.bf16 %v2903_v2, %v2903_v2 }
0x2019   :  { %2786 = vmatmul.mubr.msk.bf16.vlgmr.msra.gmra.mrb[60].mxu0 %vm82_vm0, %v2284_v3 }
0x20ec   :  { %v2331_v5 = vpop.f32.mrb[60].mxu0 }
0x20ed   :  { %v2332_v44 = vadd.f32 %v2485_v4, %v2331_v5  ;;  %v2787_v46 = vpop.f32.mrb[61].mxu0 }
0x20ee   :  { %v2334_v6 = vpop.f32.mrb[62].mxu0 }
0x20ef   :  { %v2337_v7 = vsub.f32 0.0, %v2332_v44  ;;  %v2788_v8 = vpop.f32.mrb[63].mxu0 }
0x20f1   :  { %v2338_v9 = vmul.f32 1.442695, %v2337_v7 }
0x20f3   :  { %2904 = vpow2.f32 %v2338_v9 }
0x20fd   :  { %v2905_v10 = vpop.eup %2904 }
0x20fe   :  { %v2340_v12 = vadd.f32 1.0, %v2905_v10 }
0x2100   :  { %2906 = vrcp.f32 %v2340_v12 }
0x210a   :  { %v2907_v13 = vpop.eup %2906 }
0x210b   :  { %2343 = vst [vmem:[#allocation2] sm:$0x3] %v2907_v13  ;;  %2908 = vlog2.f32 %v2907_v13  ;;  %v2351_v15 = vsub.f32 1.0, %v2907_v13 }
0x210d   :  { %2910 = vlog2.f32 %v2351_v15 }
0x2115   :  { %v2909_v16 = vpop.eup %2908 }
0x2116   :  { %v2349_v19 = vmul.f32 0.6931472, %v2909_v16 }
0x2117   :  { %v2911_v21 = vpop.eup %2910 }
0x2118   :  { %v2350_v24 = vmax.f32 %v2349_v19, -100.0  ;;  %v2353_v52 = vmul.f32 0.6931472, %v2911_v21 }
0x211a   :  { %v2354_v56 = vmax.f32 %v2353_v52, -100.0  ;;  %v2355_v57 = vmul.f32 %v2350_v24, %v2344_v18 }
0x211c   :  { %v2357_v27 = vmul.f32 %v2356_v25, %v2354_v56 }
0x211e   :  { %v2358_v28 = vadd.f32 %v2357_v27, %v2355_v57 }
0x2120   :  { %v2359_v29 = vsub.f32 0.0, %v2358_v28 }
0x2122   :  { %v2360_v30 = vsel %vm2347_vm6, %v2359_v29, 0.0 }
0x2123   :  { %v2362_v31 = vsel %vm2361_vm7, %v2360_v30, 0.0 }
0x2124   :  { %2363 = vadd.xlane.f32.xlu0 %v2362_v31 }
0x2125   :  { %2925 = shalt.err (!%p2922_p4)
}
0x2126   :  { %s2926_s28 = scalar_lea.hbm %s3697_s22, 32 }
0x2127   :  { %p2927_p5 = scmp.ne.s32.totalorder %s3697_s22, %s2926_s28  ;;  %p2930_p6 = scmp.lt.u32.totalorder %s2926_s28, %s3697_s22 }
0x2129   :  { %p2932_p7 = pnand %p2930_p6, %p2927_p5 }
0x212b   :  { %2935 = shalt.err (!%p2932_p7)
}
0x212c   :  { %2387 = dma.vmem_to_hbm [thread:$0]  %s2385_s6, 32, %s3697_s22, [#allocation3]   ;;  %vm2376_vm8 = vcmask 0  }
0x212d   :  { %s2977_s8 = smov [#allocation4]  }
0x212e   :  { %s2394_s9 = sshll.u32 %s2977_s8, 4  ;;  %s2395_s9 = int_to_ptr.vmem [resolvable:$true] %s2394_s9 }
0x212f   :  { %s2936_s4 = scalar_lea.vmem %s2395_s9, 16  ;;  %s2940_s2 = scalar_lea.vmem %s2395_s9, 32 }
0x2130   :  { %p2937_p8 = scmp.ne.s32.totalorder %s2395_s9, %s2936_s4  ;;  %p2941_p9 = scmp.lt.s32.totalorder %s2395_s9, %s2395_s9 }
0x2131   :  { %p2942_p10 = scmp.lt.s32.totalorder %s2940_s2, %s2936_s4 }
0x2133   :  { %p2943_p11 = por %p2942_p10, %p2941_p9 }
0x2135   :  { %p2944_p12 = pnand %p2943_p11, %p2937_p8 }
0x21b1   :  { %v2364_v45 = vpop.xlane.xlu0 %2363 }
0x21b2   :  { %v2365_v32 = vrot.slane %v2364_v45, 4 }
0x21b4   :  { %v2366_v11 = vadd.f32 %v2365_v32, %v2364_v45 }
0x21b6   :  { %v2367_v14 = vrot.slane %v2366_v11, 2 }
0x21b8   :  { %v2368_v33 = vadd.f32 %v2367_v14, %v2366_v11 }
0x21ba   :  { %v2369_v34 = vrot.slane %v2368_v33, 1 }
0x21bc   :  { %v2370_v37 = vadd.f32 %v2369_v34, %v2368_v33 }
0x21be   :  { %2792 = vpush %v2370_v37 }
0x21ef   :  { %s2793_s29 = spop %2792 }
0x21f0   :  { %s2374_s30 = smul.f32 0.083333336, %s2793_s29 }
0x21f2   :  { %v2375_v20 = vstv %s2374_s30 }
0x21f3   :  { %2377 = vst.msk [vmem:[#allocation4] sm:$0x1] %vm2376_vm8, %v2375_v20 }
0x21f4   :  { %2947 = shalt.err (!%p2944_p12)
}
0x21f5   :  { %s2948_s3 = scalar_lea.hbm %s3698_s23, 16 }
0x21f6   :  { %p2949_p13 = scmp.ne.s32.totalorder %s3698_s23, %s2948_s3  ;;  %p2952_p0 = scmp.lt.u32.totalorder %s2948_s3, %s3698_s23 }
0x21f8   :  { %p2954_p1 = pnand %p2952_p0, %p2949_p13 }
0x21fa   :  { %2957 = shalt.err (!%p2954_p1)
}
0x21fb   :  { %2397 = dma.vmem_to_hbm [thread:$0]  %s2395_s9, 16, %s3698_s23, [#allocation5]  }
0x21fc   :  { %2958 = dma.done.wait [#allocation3], 32  }
0x21fd   :  { %2959 = vsyncadd [#allocation3], 4294967264 }
0x21fe   :  { %2960 = dma.done.wait [#allocation5], 16  }
0x21ff   :  { %2961 = vsyncadd [#allocation5], 4294967280 }
0x2200   :  { %2404 = vsyncpa [#allocation3], 1 }
0x2201   :  { %2405 = vsyncpa [#allocation5], 1 }

</bundles_post_ra>
